<compile_context>
chip_gen: v7x
topology: tpu7x:2x2x1
jax: 0.10.0
libtpu: 0.0.40
codegen_flags: <defaults>
</compile_context>

<pallas_src>
import math

import jax
import jax.numpy as jnp
from jax.experimental import pallas as pl
from jax.experimental.pallas import tpu as pltpu

# Small, module-consistent sizes (module defaults are 100/100/100 with hidden=64).
N_STEPS = 16
TIME_EMB_DIM = 32
ENV_SPACE = 32
HIDDEN = 64          # hardcoded 64 in the PyTorch module
F = 128              # lane width used for the final (lane-dense) output


def _round_up(x, m):
    return (x + m - 1) // m * m


def sinusoidal_embedding(n, d):
    # Exact port of the PyTorch helper (d assumed even, as in the module defaults).
    j = jnp.arange(d, dtype=jnp.float32)
    wk = 1.0 / (10000.0 ** (2.0 * j / d))            # [d]
    t = jnp.arange(n, dtype=jnp.float32)[:, None]    # [n, 1]
    wk_even = wk[::2][None, :]                       # [1, d//2]
    emb = jnp.zeros((n, d), jnp.float32)
    emb = emb.at[:, ::2].set(jnp.sin(t * wk_even))
    emb = emb.at[:, 1::2].set(jnp.cos(t * wk_even))
    return emb


def _silu(z):
    return z * jax.nn.sigmoid(z)


def _relu(z):
    return jnp.maximum(z, 0.0)


# ----------------------------------------------------------------------------
# Kernel
# ----------------------------------------------------------------------------
def networks_kernel(t_ref, x_ref, te_ref, w0_ref, wm_ref, bm_ref, w5_ref, b5_ref,
                    out_ref):
    """One batch tile of the forward pass.

    t_ref  : [TB, 1]   int32 timestep per row
    x_ref  : [TB, 32]  input (unpadded ENV_SPACE width)
    te_ref : [2, 16, 64]  per-timestep folded biases (te1@W0+b0 | te2@W3+b3)
    w0_ref : [32, 64]  layer-0 weight (true K=ENV_SPACE fan-in)
    wm_ref : [4, 64, 64]  layers 1,2,3,4 weights
    bm_ref : [4, 1, 64]   layers 1,2,3,4 biases (index 2 zero: folded into te_ref[1])
    w5_ref : [64, 128]    final weight, output lanes padded to 128
    b5_ref : [1, 128]     final bias, lane padded
    out_ref: [TB, 128]    lane-dense output (first ENV_SPACE cols valid)
    """
    f32 = jnp.float32
    tb = t_ref.shape[0]

    def mm(a, b):
        return jnp.dot(a, b, preferred_element_type=f32)

    # Exact one-hot gather of the per-timestep folded biases (built in-register;
    # no HBM one-hot array, no embedding gather).
    steps = jax.lax.broadcasted_iota(jnp.int32, (tb, N_STEPS), 1)
    toh = (t_ref[...] == steps).astype(f32)                       # [TB, 16]
    tbias0 = mm(toh, te_ref[0])                                   # te1(t) @ W0 + b0
    tbias3 = mm(toh, te_ref[1])                                   # te2(t) @ W3 + b3

    # networks_1: Linear(32->64) ReLU Linear ReLU Linear   (te1 folded into bias)
    h = _relu(mm(x_ref[...], w0_ref[...]) + tbias0)
    h = _relu(mm(h, wm_ref[0]) + bm_ref[0])
    h = mm(h, wm_ref[1]) + bm_ref[1]

    # networks_2: Linear ReLU Linear ReLU Linear(64->32)   (te2 folded into bias)
    g = _relu(mm(h, wm_ref[2]) + tbias3)
    g = _relu(mm(g, wm_ref[3]) + bm_ref[3])
    out_ref[...] = mm(g, w5_ref[...]) + b5_ref[...]               # lane-dense store


# ----------------------------------------------------------------------------
# Parameter construction / packing
# ----------------------------------------------------------------------------
def init_linear(key, d_in, d_out):
    # nn.Linear default init: U(-1/sqrt(in), 1/sqrt(in)) for weight and bias.
    kw, kb = jax.random.split(key)
    bound = 1.0 / math.sqrt(d_in)
    w = jax.random.uniform(kw, (d_in, d_out), jnp.float32, -bound, bound)  # [in, out]
    b = jax.random.uniform(kb, (1, d_out), jnp.float32, -bound, bound)     # [1, out]
    return w, b


def init_params(key):
    keys = jax.random.split(key, 10)
    p = {}
    p["emb"] = sinusoidal_embedding(N_STEPS, TIME_EMB_DIM)      # frozen embedding table
    p["te1"] = [init_linear(keys[0], TIME_EMB_DIM, ENV_SPACE),
                init_linear(keys[1], ENV_SPACE, ENV_SPACE)]
    p["n1"] = [init_linear(keys[2], ENV_SPACE, HIDDEN),
               init_linear(keys[3], HIDDEN, HIDDEN),
               init_linear(keys[4], HIDDEN, HIDDEN)]
    p["te2"] = [init_linear(keys[5], TIME_EMB_DIM, HIDDEN),
                init_linear(keys[6], HIDDEN, HIDDEN)]
    p["n2"] = [init_linear(keys[7], HIDDEN, HIDDEN),
               init_linear(keys[8], HIDDEN, HIDDEN),
               init_linear(keys[9], HIDDEN, ENV_SPACE)]
    return p


def pack_params(params):
    """Precompute/pack everything the kernel needs (host-side, once)."""
    def te_mlp(emb, layers):
        (w1, b1), (w2, b2) = layers
        return _silu(emb @ w1 + b1) @ w2 + b2

    # Per-timestep folded bias table:
    #   te_tab[0, t] = te1(t) @ W0 + b0      (bias of networks_1 layer 0)
    #   te_tab[1, t] = te2(t) @ W3 + b3      (bias of networks_2 layer 0)
    te1 = te_mlp(params["emb"], params["te1"])            # [16, ENV_SPACE]
    te2 = te_mlp(params["emb"], params["te2"])            # [16, HIDDEN]
    w0, b0 = params["n1"][0]
    w3, b3 = params["n2"][0]
    te_tab = jnp.stack([te1 @ w0 + b0, te2 @ w3 + b3])    # [2, 16, 64]

    # Layer-0 weight with its natural K=ENV_SPACE fan-in (bias folded above).
    w0_arr = w0                                            # [32, 64]

    # Middle layers 1..4 (n1[1], n1[2], n2[0], n2[1]); n2[0]'s bias is folded.
    mids = [params["n1"][1], params["n1"][2], params["n2"][0], params["n2"][1]]
    wmid = jnp.stack([w for w, _ in mids])                 # [4, 64, 64]
    bmid = jnp.stack([b for _, b in mids])                 # [4, 1, 64]
    bmid = bmid.at[2].set(0.0)                             # folded into te_tab[1]

    # Final layer padded to 128 output lanes for an unmasked, lane-dense store.
    w5, b5 = params["n2"][2]
    w5p = jnp.zeros((HIDDEN, F), jnp.float32).at[:, :ENV_SPACE].set(w5)
    b5p = jnp.zeros((1, F), jnp.float32).at[:, :ENV_SPACE].set(b5)
    return te_tab, w0_arr, wmid, bmid, w5p, b5p


# ----------------------------------------------------------------------------
# Forward wrapper
# ----------------------------------------------------------------------------
def networks_forward(x, t, te_tab, w0, wmid, bmid, w5p, b5p, *, tile_b=1024):
    """x: [B, ENV_SPACE] f32, t: [B] int32 in [0, N_STEPS)."""
    B = x.shape[0]

    # Tile selection: large tiles amortize the ~0.35us/step grid overhead, but keep
    # at least 2 grid steps whenever the batch can be split so ("parallel",) can
    # shard the batch across v7x's two TensorCores.  Multiple of 8 (sublanes).
    half = _round_up(pl.cdiv(B, 2), 8)
    tile_b = max(8, min(tile_b, half))
    B_pad = _round_up(B, tile_b)
    grid = (B_pad // tile_b,)

    t2 = t.reshape(B, 1).astype(jnp.int32)
    if B_pad != B:
        # Only cheap row padding (32-wide x, 1-wide t); padded rows use t=0 and are
        # sliced away below.
        x = jnp.pad(x, ((0, B_pad - B), (0, 0)))
        t2 = jnp.pad(t2, ((0, B_pad - B), (0, 0)))

    out = pl.pallas_call(
        networks_kernel,
        out_shape=jax.ShapeDtypeStruct((B_pad, F), jnp.float32),
        grid=grid,
        in_specs=[
            pl.BlockSpec((tile_b, 1), lambda i: (i, 0)),             # t tile
            pl.BlockSpec((tile_b, ENV_SPACE), lambda i: (i, 0)),     # x tile (unpadded lanes)
            pl.BlockSpec((2, N_STEPS, HIDDEN), lambda i: (0, 0, 0)),  # folded te bias table
            pl.BlockSpec((ENV_SPACE, HIDDEN), lambda i: (0, 0)),     # layer-0 weight (K=32)
            pl.BlockSpec((4, HIDDEN, HIDDEN), lambda i: (0, 0, 0)),  # layers 1-4 weights
            pl.BlockSpec((4, 1, HIDDEN), lambda i: (0, 0, 0)),       # layers 1-4 biases
            pl.BlockSpec((HIDDEN, F), lambda i: (0, 0)),             # final weight (lane-dense N)
            pl.BlockSpec((1, F), lambda i: (0, 0)),                  # final bias
        ],
        out_specs=pl.BlockSpec((tile_b, F), lambda i: (i, 0)),
        compiler_params=pltpu.CompilerParams(
            dimension_semantics=("parallel",)),                       # megacore on v7x
    )(t2, x, te_tab, w0, wmid, bmid, w5p, b5p)

    return out[:B, :ENV_SPACE]


# ----------------------------------------------------------------------------
# Pure-JAX reference (mirrors the PyTorch forward exactly)
# ----------------------------------------------------------------------------
def reference_forward(x, t, params):
    def lin(h, wb):
        w, b = wb
        return h @ w + b

    t_emb = params["emb"][t]                                    # Embedding lookup
    te1 = lin(_silu(lin(t_emb, params["te1"][0])), params["te1"][1])
    h = x + te1
    h = _relu(lin(h, params["n1"][0]))
    h = _relu(lin(h, params["n1"][1]))
    h = lin(h, params["n1"][2])
    te2 = lin(_silu(lin(t_emb, params["te2"][0])), params["te2"][1])
    g = h + te2
    g = _relu(lin(g, params["n2"][0]))
    g = _relu(lin(g, params["n2"][1]))
    return lin(g, params["n2"][2])


if __name__ == "__main__":
    key = jax.random.PRNGKey(0)
    kp, kx, kt = jax.random.split(key, 3)

    params = init_params(kp)
    slabs = pack_params(params)      # built once, reused for every forward

    B = 200                          # not a multiple of the tile -> exercises row padding
    x = jax.random.normal(kx, (B, ENV_SPACE), dtype=jnp.float32)
    t = jax.random.randint(kt, (B,), 0, N_STEPS, dtype=jnp.int32)

    out = networks_forward(x, t, *slabs)
    jax.block_until_ready(out)

    ref = reference_forward(x, t, params)
    assert out.shape == (B, ENV_SPACE)
    assert jnp.allclose(out, ref, atol=2e-4, rtol=2e-4), "Pallas output mismatch vs reference"

    # Tiny-batch path (single small tile, grid of 1).
    out_small = networks_forward(x[:3], t[:3], *slabs)
    jax.block_until_ready(out_small)
    assert jnp.allclose(out_small, ref[:3], atol=2e-4, rtol=2e-4), "small-batch mismatch"

    print("KERNEL_OK")
</pallas_src>

<mosaic_0001>
module attributes {stable_mosaic.version = 11 : i64} {
  func.func @networks_kernel(%arg0: i32, %arg1: memref<104x1xi32, #tpu.memory_space<vmem>>, %arg2: memref<104x32xf32, #tpu.memory_space<vmem>>, %arg3: memref<2x16x64xf32, #tpu.memory_space<vmem>>, %arg4: memref<32x64xf32, #tpu.memory_space<vmem>>, %arg5: memref<4x64x64xf32, #tpu.memory_space<vmem>>, %arg6: memref<4x1x64xf32, #tpu.memory_space<vmem>>, %arg7: memref<64x128xf32, #tpu.memory_space<vmem>>, %arg8: memref<1x128xf32, #tpu.memory_space<vmem>>, %arg9: memref<104x128xf32, #tpu.memory_space<vmem>>) attributes {dimension_semantics = [#tpu.dimension_semantics<parallel>], iteration_bounds = array<i64: 2>, scalar_prefetch = 0 : i64, scratch_operands = 0 : i64, tpu.core_type = #tpu.core_type<tc>, window_params = [{transform_indices = @transform_0, window_bounds = array<i64: 104, 1>}, {transform_indices = @transform_1, window_bounds = array<i64: 104, 32>}, {pipeline_mode = #tpu.pipeline_mode<synchronous>, transform_indices = @transform_2, window_bounds = array<i64: 2, 16, 64>}, {pipeline_mode = #tpu.pipeline_mode<synchronous>, transform_indices = @transform_3, window_bounds = array<i64: 32, 64>}, {pipeline_mode = #tpu.pipeline_mode<synchronous>, transform_indices = @transform_4, window_bounds = array<i64: 4, 64, 64>}, {pipeline_mode = #tpu.pipeline_mode<synchronous>, transform_indices = @transform_5, window_bounds = array<i64: 4, 1, 64>}, {pipeline_mode = #tpu.pipeline_mode<synchronous>, transform_indices = @transform_6, window_bounds = array<i64: 64, 128>}, {pipeline_mode = #tpu.pipeline_mode<synchronous>, transform_indices = @transform_7, window_bounds = array<i64: 1, 128>}, {transform_indices = @transform_8, window_bounds = array<i64: 104, 128>}]} {
    %0 = tpu.iota {dimensions = array<i32: 1>} : vector<104x16xi32>
    %c0 = arith.constant 0 : index
    %c0_0 = arith.constant 0 : index
    %1 = vector.load %arg1[%c0, %c0_0] : memref<104x1xi32, #tpu.memory_space<vmem>>, vector<104x1xi32>
    %2 = vector.broadcast %1 : vector<104x1xi32> to vector<104x16xi32>
    %3 = arith.cmpi eq, %2, %0 : vector<104x16xi32>
    %4 = arith.extui %3 : vector<104x16xi1> to vector<104x16xi32>
    %5 = arith.sitofp %4 : vector<104x16xi32> to vector<104x16xf32>
    %c0_1 = arith.constant 0 : index
    %c0_2 = arith.constant 0 : index
    %c0_3 = arith.constant 0 : index
    %6 = vector.load %arg3[%c0_1, %c0_2, %c0_3] : memref<2x16x64xf32, #tpu.memory_space<vmem>>, vector<1x16x64xf32>
    %7 = vector.shape_cast %6 : vector<1x16x64xf32> to vector<16x64xf32>
    %cst = arith.constant dense<0.000000e+00> : vector<104x64xf32>
    %8 = tpu.matmul %5, %7, %cst {dimension_numbers = #tpu.dot_dimension_numbers<[1], [0], [0], [1], [0, 0, 1, 1], [], []>} : vector<104x16xf32>, vector<16x64xf32>, vector<104x64xf32> -> vector<104x64xf32>
    %c1 = arith.constant 1 : index
    %c0_4 = arith.constant 0 : index
    %c0_5 = arith.constant 0 : index
    %9 = vector.load %arg3[%c1, %c0_4, %c0_5] : memref<2x16x64xf32, #tpu.memory_space<vmem>>, vector<1x16x64xf32>
    %10 = vector.shape_cast %9 : vector<1x16x64xf32> to vector<16x64xf32>
    %cst_6 = arith.constant dense<0.000000e+00> : vector<104x64xf32>
    %11 = tpu.matmul %5, %10, %cst_6 {dimension_numbers = #tpu.dot_dimension_numbers<[1], [0], [0], [1], [0, 0, 1, 1], [], []>} : vector<104x16xf32>, vector<16x64xf32>, vector<104x64xf32> -> vector<104x64xf32>
    %c0_7 = arith.constant 0 : index
    %c0_8 = arith.constant 0 : index
    %12 = vector.load %arg2[%c0_7, %c0_8] : memref<104x32xf32, #tpu.memory_space<vmem>>, vector<104x32xf32>
    %c0_9 = arith.constant 0 : index
    %c0_10 = arith.constant 0 : index
    %13 = vector.load %arg4[%c0_9, %c0_10] : memref<32x64xf32, #tpu.memory_space<vmem>>, vector<32x64xf32>
    %cst_11 = arith.constant dense<0.000000e+00> : vector<104x64xf32>
    %14 = tpu.matmul %12, %13, %cst_11 {dimension_numbers = #tpu.dot_dimension_numbers<[1], [0], [0], [1], [0, 0, 1, 1], [], []>} : vector<104x32xf32>, vector<32x64xf32>, vector<104x64xf32> -> vector<104x64xf32>
    %15 = arith.addf %14, %8 : vector<104x64xf32>
    %cst_12 = arith.constant 0.000000e+00 : f32
    %16 = vector.broadcast %cst_12 : f32 to vector<104x64xf32>
    %17 = arith.maximumf %15, %16 : vector<104x64xf32>
    %c0_13 = arith.constant 0 : index
    %c0_14 = arith.constant 0 : index
    %c0_15 = arith.constant 0 : index
    %18 = vector.load %arg5[%c0_13, %c0_14, %c0_15] : memref<4x64x64xf32, #tpu.memory_space<vmem>>, vector<1x64x64xf32>
    %19 = vector.shape_cast %18 : vector<1x64x64xf32> to vector<64x64xf32>
    %cst_16 = arith.constant dense<0.000000e+00> : vector<104x64xf32>
    %20 = tpu.matmul %17, %19, %cst_16 {dimension_numbers = #tpu.dot_dimension_numbers<[1], [0], [0], [1], [0, 0, 1, 1], [], []>} : vector<104x64xf32>, vector<64x64xf32>, vector<104x64xf32> -> vector<104x64xf32>
    %c0_17 = arith.constant 0 : index
    %c0_18 = arith.constant 0 : index
    %c0_19 = arith.constant 0 : index
    %21 = vector.load %arg6[%c0_17, %c0_18, %c0_19] : memref<4x1x64xf32, #tpu.memory_space<vmem>>, vector<1x1x64xf32>
    %22 = vector.shape_cast %21 : vector<1x1x64xf32> to vector<1x64xf32>
    %23 = vector.broadcast %22 : vector<1x64xf32> to vector<104x64xf32>
    %24 = arith.addf %20, %23 : vector<104x64xf32>
    %cst_20 = arith.constant 0.000000e+00 : f32
    %25 = vector.broadcast %cst_20 : f32 to vector<104x64xf32>
    %26 = arith.maximumf %24, %25 : vector<104x64xf32>
    %c1_21 = arith.constant 1 : index
    %c0_22 = arith.constant 0 : index
    %c0_23 = arith.constant 0 : index
    %27 = vector.load %arg5[%c1_21, %c0_22, %c0_23] : memref<4x64x64xf32, #tpu.memory_space<vmem>>, vector<1x64x64xf32>
    %28 = vector.shape_cast %27 : vector<1x64x64xf32> to vector<64x64xf32>
    %cst_24 = arith.constant dense<0.000000e+00> : vector<104x64xf32>
    %29 = tpu.matmul %26, %28, %cst_24 {dimension_numbers = #tpu.dot_dimension_numbers<[1], [0], [0], [1], [0, 0, 1, 1], [], []>} : vector<104x64xf32>, vector<64x64xf32>, vector<104x64xf32> -> vector<104x64xf32>
    %c1_25 = arith.constant 1 : index
    %c0_26 = arith.constant 0 : index
    %c0_27 = arith.constant 0 : index
    %30 = vector.load %arg6[%c1_25, %c0_26, %c0_27] : memref<4x1x64xf32, #tpu.memory_space<vmem>>, vector<1x1x64xf32>
    %31 = vector.shape_cast %30 : vector<1x1x64xf32> to vector<1x64xf32>
    %32 = vector.broadcast %31 : vector<1x64xf32> to vector<104x64xf32>
    %33 = arith.addf %29, %32 : vector<104x64xf32>
    %c2 = arith.constant 2 : index
    %c0_28 = arith.constant 0 : index
    %c0_29 = arith.constant 0 : index
    %34 = vector.load %arg5[%c2, %c0_28, %c0_29] : memref<4x64x64xf32, #tpu.memory_space<vmem>>, vector<1x64x64xf32>
    %35 = vector.shape_cast %34 : vector<1x64x64xf32> to vector<64x64xf32>
    %cst_30 = arith.constant dense<0.000000e+00> : vector<104x64xf32>
    %36 = tpu.matmul %33, %35, %cst_30 {dimension_numbers = #tpu.dot_dimension_numbers<[1], [0], [0], [1], [0, 0, 1, 1], [], []>} : vector<104x64xf32>, vector<64x64xf32>, vector<104x64xf32> -> vector<104x64xf32>
    %37 = arith.addf %36, %11 : vector<104x64xf32>
    %cst_31 = arith.constant 0.000000e+00 : f32
    %38 = vector.broadcast %cst_31 : f32 to vector<104x64xf32>
    %39 = arith.maximumf %37, %38 : vector<104x64xf32>
    %c3 = arith.constant 3 : index
    %c0_32 = arith.constant 0 : index
    %c0_33 = arith.constant 0 : index
    %40 = vector.load %arg5[%c3, %c0_32, %c0_33] : memref<4x64x64xf32, #tpu.memory_space<vmem>>, vector<1x64x64xf32>
    %41 = vector.shape_cast %40 : vector<1x64x64xf32> to vector<64x64xf32>
    %cst_34 = arith.constant dense<0.000000e+00> : vector<104x64xf32>
    %42 = tpu.matmul %39, %41, %cst_34 {dimension_numbers = #tpu.dot_dimension_numbers<[1], [0], [0], [1], [0, 0, 1, 1], [], []>} : vector<104x64xf32>, vector<64x64xf32>, vector<104x64xf32> -> vector<104x64xf32>
    %c3_35 = arith.constant 3 : index
    %c0_36 = arith.constant 0 : index
    %c0_37 = arith.constant 0 : index
    %43 = vector.load %arg6[%c3_35, %c0_36, %c0_37] : memref<4x1x64xf32, #tpu.memory_space<vmem>>, vector<1x1x64xf32>
    %44 = vector.shape_cast %43 : vector<1x1x64xf32> to vector<1x64xf32>
    %45 = vector.broadcast %44 : vector<1x64xf32> to vector<104x64xf32>
    %46 = arith.addf %42, %45 : vector<104x64xf32>
    %cst_38 = arith.constant 0.000000e+00 : f32
    %47 = vector.broadcast %cst_38 : f32 to vector<104x64xf32>
    %48 = arith.maximumf %46, %47 : vector<104x64xf32>
    %c0_39 = arith.constant 0 : index
    %c0_40 = arith.constant 0 : index
    %49 = vector.load %arg7[%c0_39, %c0_40] : memref<64x128xf32, #tpu.memory_space<vmem>>, vector<64x128xf32>
    %cst_41 = arith.constant dense<0.000000e+00> : vector<104x128xf32>
    %50 = tpu.matmul %48, %49, %cst_41 {dimension_numbers = #tpu.dot_dimension_numbers<[1], [0], [0], [1], [0, 0, 1, 1], [], []>} : vector<104x64xf32>, vector<64x128xf32>, vector<104x128xf32> -> vector<104x128xf32>
    %c0_42 = arith.constant 0 : index
    %c0_43 = arith.constant 0 : index
    %51 = vector.load %arg8[%c0_42, %c0_43] : memref<1x128xf32, #tpu.memory_space<vmem>>, vector<1x128xf32>
    %52 = vector.broadcast %51 : vector<1x128xf32> to vector<104x128xf32>
    %53 = arith.addf %50, %52 : vector<104x128xf32>
    %c0_44 = arith.constant 0 : index
    %c0_45 = arith.constant 0 : index
    %54 = vector.load %arg9[%c0_44, %c0_45] : memref<104x128xf32, #tpu.memory_space<vmem>>, vector<104x128xf32>
    tpu.vector_store %arg9[%c0_44, %c0_45], %53 {strides = array<i32>} : memref<104x128xf32, #tpu.memory_space<vmem>>, vector<104x128xf32>,
    return
  }
  func.func @transform_0(%arg0: i32) -> (i32, i32) {
    %c0_i32 = arith.constant 0 : i32
    %c0_i32_0 = arith.constant 0 : i32
    return %arg0, %c0_i32 : i32, i32
  }
  func.func @transform_1(%arg0: i32) -> (i32, i32) {
    %c0_i32 = arith.constant 0 : i32
    %c0_i32_0 = arith.constant 0 : i32
    return %arg0, %c0_i32 : i32, i32
  }
  func.func @transform_2(%arg0: i32) -> (i32, i32, i32) {
    %c0_i32 = arith.constant 0 : i32
    %c0_i32_0 = arith.constant 0 : i32
    %c0_i32_1 = arith.constant 0 : i32
    %c0_i32_2 = arith.constant 0 : i32
    return %c0_i32, %c0_i32_0, %c0_i32_1 : i32, i32, i32
  }
  func.func @transform_3(%arg0: i32) -> (i32, i32) {
    %c0_i32 = arith.constant 0 : i32
    %c0_i32_0 = arith.constant 0 : i32
    %c0_i32_1 = arith.constant 0 : i32
    return %c0_i32, %c0_i32_0 : i32, i32
  }
  func.func @transform_4(%arg0: i32) -> (i32, i32, i32) {
    %c0_i32 = arith.constant 0 : i32
    %c0_i32_0 = arith.constant 0 : i32
    %c0_i32_1 = arith.constant 0 : i32
    %c0_i32_2 = arith.constant 0 : i32
    return %c0_i32, %c0_i32_0, %c0_i32_1 : i32, i32, i32
  }
  func.func @transform_5(%arg0: i32) -> (i32, i32, i32) {
    %c0_i32 = arith.constant 0 : i32
    %c0_i32_0 = arith.constant 0 : i32
    %c0_i32_1 = arith.constant 0 : i32
    %c0_i32_2 = arith.constant 0 : i32
    return %c0_i32, %c0_i32_0, %c0_i32_1 : i32, i32, i32
  }
  func.func @transform_6(%arg0: i32) -> (i32, i32) {
    %c0_i32 = arith.constant 0 : i32
    %c0_i32_0 = arith.constant 0 : i32
    %c0_i32_1 = arith.constant 0 : i32
    return %c0_i32, %c0_i32_0 : i32, i32
  }
  func.func @transform_7(%arg0: i32) -> (i32, i32) {
    %c0_i32 = arith.constant 0 : i32
    %c0_i32_0 = arith.constant 0 : i32
    %c0_i32_1 = arith.constant 0 : i32
    return %c0_i32, %c0_i32_0 : i32, i32
  }
  func.func @transform_8(%arg0: i32) -> (i32, i32) {
    %c0_i32 = arith.constant 0 : i32
    %c0_i32_0 = arith.constant 0 : i32
    return %arg0, %c0_i32 : i32, i32
  }
}

</mosaic_0001>

<bundles_post_ra>
// kernel: tpu_custom_call.1
= control target key start
LH: loop header
LB: loop body
LE: loop exit
PB: predicated region body
PF: predicated region fallthrough
CT: control target
= control target key end

     0   :  { %13 = vsyncpa [#allocation3], 0  ;;  %s3690_s0 = inlined_call_operand.vmem [shape: s32[208,1], index: 0, kind: input, shape index: {}]   ;;  %s3691_s1 = inlined_call_operand.vmem [shape: f32[208,32], index: 1, kind: input, shape index: {}]   ;;  %s3692_s2 = inlined_call_operand.vmem [shape: f32[2,16,64], index: 2, kind: input, shape index: {}]   ;;  %s3693_s3 = inlined_call_operand.vmem [shape: f32[32,64], index: 3, kind: input, shape index: {}]   ;;  %s3694_s4 = inlined_call_operand.vmem [shape: f32[4,64,64], index: 4, kind: input, shape index: {}]   ;;  %s3695_s5 = inlined_call_operand.vmem [shape: f32[4,1,64], index: 5, kind: input, shape index: {}]   ;;  %s3696_s6 = inlined_call_operand.vmem [shape: f32[64,128], index: 6, kind: input, shape index: {}]   ;;  %s3697_s7 = inlined_call_operand.vmem [shape: f32[1,128], index: 7, kind: input, shape index: {}]   ;;  %s3698_s8 = inlined_call_operand.hbm [shape: f32[208,128], index: 8, kind: output, shape index: {}]  }
   0x1   :  { %15 = vsyncpa [#allocation3 + $0x1], 0  ;;  %s2993_s27 = smov 0   ;;  %s2995_s28 = smov 0  }
   0x2   :  { %s2997_s29 = smov 0   ;;  %s2999_s30 = smov 0  }
   0x3 LB: > { %s3014_s9 = sadd.s32 4294967295, %s2939_s30   ;;  %s1986_s10 = sadd.s32 4294967294, %s2939_s30   ;;  %s2939_s30 = sphi %s2999_s30, %s3704_s30   ;;  %s2935_s29 = sphi %s2997_s29, %s3703_s29   ;;  %s2931_s28 = sphi %s2995_s28, %s3702_s28   ;;  %s2927_s27 = sphi %s2993_s27, %s3701_s27  }
   0x4   : > { %s3018_s11 = sadd.s32 1, %s2939_s30   ;;  %s206_s12 = sadd.s32 1, %s2935_s29 }
   0x5   : > { %s203_s13 = ssub.s32 %s2939_s30, %s3018_s11  ;;  %p216_p0 = scmp.ne.s32.totalorder %s2935_s29, %s2931_s28 }
   0x6   : > { %p204_p1 = scmp.eq.s32.totalorder %s203_s13, 0  ;;  %p217_p2 = scmp.eq.s32.totalorder %s3014_s9, 1 }
   0x7   : > { %p222_p3 = scmp.ne.s32.totalorder %s2931_s28, %s2927_s27  ;;  %p223_p4 = scmp.eq.s32.totalorder %s1986_s10, 1 }
   0x8   : > { %s3029_s14 = scalar_select %p204_p1, %s2935_s29, %s206_s12  }
   0x9   : > { %p3031_p5 = por %p217_p2, %p216_p0  ;;  %p3035_p6 = por %p223_p4, %p222_p3 }
   0xa   : > { %p1989_p7 = scmp.ge.s32.totalorder %s2939_s30, 1  ;;  %p277_p8 = scmp.lt.s32.totalorder %s2939_s30, 3 }
   0xc   : > { %p278_p9 = pnand %p1989_p7, %p277_p8 }
   0xd   : > { %s316_s17 = smul.u32 (!%p278_p9), 13, %s3014_s9  ;;  %v422_v0 = vld [vmem:[%s3692_s2] sm:$0xff] (!%p278_p9)  ;;  %v423_v1 = vld [vmem:[%s3692_s2 + $0x8] sm:$0xff] (!%p278_p9)  ;;  %v2018_v2 = vld [vmem:[%s3692_s2 + $0x10] sm:$0xff] (!%p278_p9)  ;;  %v2941_v3 = vmov (!%p278_p9), 0   ;;  %v2942_v6 = vmov (!%p278_p9), 0.0|0.0   ;;  %v329_v22 = vlaneseq (!%p278_p9) }
   0xe   : > { %281 = sbr.rel (%p278_p9) target bundleno = 1558 (0x616), region = 52  ;;  %2876 = vset.pattern.permute.xlu1 (!%p278_p9), %v2941_v3  ;;  %2875 = vset.pattern.permute.xlu0 (!%p278_p9), %v2941_v3  ;;  %v2706_v4 = vpack.c.bf16 (!%p278_p9), %v423_v1, %v422_v0  ;;  %v2019_v5 = vld [vmem:[%s3692_s2 + $0x18] sm:$0xff] (!%p278_p9)  ;;  %vm2943_vm0 = vmmov (!%p278_p9), 0   ;;  %v2944_v12 = vmov (!%p278_p9), 0.0   ;;  %v740_v24 = vld [vmem:[%s3693_s3] sm:$0xff] (!%p278_p9)  ;;  %v741_v25 = vld [vmem:[%s3693_s3 + $0x8] sm:$0xff] (!%p278_p9) }
   0xf   : > { %p317_p10 = scmp.lt.s32.totalorder (!%p278_p9), %s316_s17, 25  ;;  %2705 = vmatprep.subr.bf16.mxu0 (!%p278_p9), %v2942_v6  ;;  %2708 = vmatprep.subr.bf16.mxu1 (!%p278_p9), %v2942_v6  ;;  %v2709_v7 = vpack.c.bf16 (!%p278_p9), %v2019_v5, %v2018_v2  ;;  %v3070_v23 = vand.u32 (!%p278_p9), 127, %v329_v22  ;;  %v927_v26 = vld [vmem:[%s3694_s4] sm:$0xff] (!%p278_p9)  ;;  %v928_v27 = vld [vmem:[%s3694_s4 + $0x8] sm:$0xff] (!%p278_p9)  ;;  %vm424_vm1 = vcmask (!%p278_p9), 130048   ;;  %v2712_v29 = vpack.c.bf16 (!%p278_p9), %v741_v25, %v740_v24  ;;  %v742_v31 = vld [vmem:[%s3693_s3 + $0x10] sm:$0xff] (!%p278_p9) }
  0x10   : > { %2707 = vmatpush3.bf16.msra.mxu0 (!%p278_p9), %v2706_v4  ;;  %2301 = vmatprep.mubr.msk.f32.mxu0 (!%p278_p9), %vm2943_vm0, %v2944_v12  ;;  %v743_v32 = vld [vmem:[%s3693_s3 + $0x18] sm:$0xff] (!%p278_p9)  ;;  %v2718_v33 = vpack.c.bf16 (!%p278_p9), %v928_v27, %v927_v26  ;;  %v929_v34 = vld [vmem:[%s3694_s4 + $0x10] sm:$0xff] (!%p278_p9)  ;;  %v931_v41 = vld [vmem:[%s3694_s4 + $0x20] sm:$0xff] (!%p278_p9)  ;;  %vm744_vm15 = vcmask (!%p278_p9), 261120   ;;  %s313_s10 = sand.u32 (!%p278_p9), 1, %s2931_s28   ;;  %s2144_s20 = smul.u32 (!%p278_p9), 1664, %s3014_s9 }
  0x11   : > { %2710 = vmatpush3.bf16.msra.mxu1 (!%p278_p9), %v2709_v7  ;;  %2711 = vmatprep.subr.bf16.mxu0 (!%p278_p9), %v2942_v6  ;;  %v930_v35 = vld [vmem:[%s3694_s4 + $0x18] sm:$0xff] (!%p278_p9)  ;;  %v2715_v38 = vpack.c.bf16 (!%p278_p9), %v743_v32, %v742_v31  ;;  %v932_v42 = vld [vmem:[%s3694_s4 + $0x28] sm:$0xff] (!%p278_p9)  ;;  %v933_v46 = vld [vmem:[%s3694_s4 + $0x30] sm:$0xff] (!%p278_p9)  ;;  %s2829_s12 = smul.u32 (!%p278_p9), 104, %s313_s10  ;;  %s3649_s9 = scalar_lea.sflag (!%p278_p9), [#allocation3], %s313_s10 }
  0x12   : > { %2717 = vmatprep.subr.bf16.mxu1 (!%p278_p9), %v2942_v6  ;;  %2344 = vmatprep.mubr.msk.f32.mxu1 (!%p278_p9), %vm2943_vm0, %v2944_v12  ;;  %v2721_v40 = vpack.c.bf16 (!%p278_p9), %v930_v35, %v929_v34  ;;  %v2724_v45 = vpack.c.bf16 (!%p278_p9), %v932_v42, %v931_v41  ;;  %v934_v47 = vld [vmem:[%s3694_s4 + $0x38] sm:$0xff] (!%p278_p9)  ;;  %v2064_v25 = vld [vmem:[%s3694_s4 + $0x60] sm:$0xff] (!%p278_p9)  ;;  %v2065_v26 = vld [vmem:[%s3694_s4 + $0x68] sm:$0xff] (!%p278_p9)  ;;  %s2945_s24 = smov (!%p278_p9), [#allocation2]  }
  0x13   : > { %v2727_v50 = vpack.c.bf16 (!%p278_p9), %v934_v47, %v933_v46  ;;  %v2736_v27 = vpack.c.bf16 (!%p278_p9), %v2065_v26, %v2064_v25  ;;  %s3623_s19 = scalar_lea.vmem (!%p278_p9), [#allocation2], %s2829_s12  ;;  %s2881_s25 = sshll.u32 (!%p278_p9), %s2945_s24, 4  ;;  %s2882_s25 = int_to_ptr.vmem [resolvable:$false] %s2881_s25 }
  0x14   : > { %s1912_s21 = sshll.u32 (!%p278_p9), %s3623_s19, 4  ;;  %s2883_s12 = scalar_lea.vmem (!%p278_p9), %s2882_s25, 3328  ;;  %s3644_s21 = int_to_ptr.vmem [resolvable:$true] %s1912_s21 }
  0x15   : > { %s3706_s17 = smov (!%p317_p10, %s316_s17), 25  ;;  %s2877_s23 = scalar_lea.vmem %s3644_s21, 1664 }
  0x16   : > { %s1990_s26 = sshll.u32 %s3706_s17, 3  ;;  %p2878_p11 = scmp.ne.s32.totalorder %s3644_s21, %s2877_s23 }
  0x17   : > { %s320_s13 = scalar_lea.vmem %s3690_s0, %s1990_s26  ;;  %s3216_s22 = scalar_lea.vmem %s3691_s1, %s1990_s26 }
  0x18   : > { %v333_v8 = vld [vmem:[%s320_s13 + $0x10] sm:$0xff]  ;;  %v331_v9 = vld [vmem:[%s320_s13] sm:$0xff]  ;;  %v334_v10 = vld [vmem:[%s320_s13 + $0x18] sm:$0xff]  ;;  %s3642_s26 = scalar_lea.hbm %s3698_s8, %s2144_s20  ;;  %p2879_p12 = pnand %p2878_p11, %p3031_p5 }
  0x19   : > { %351 = vperm.xlu1 %2876, %v333_v8   ;;  %345 = vperm.xlu0 %2875, %v331_v9   ;;  %v332_v11 = vld [vmem:[%s320_s13 + $0x8] sm:$0xff]  ;;  %v335_v14 = vld [vmem:[%s320_s13 + $0x20] sm:$0xff]  ;;  %v338_v15 = vld [vmem:[%s320_s13 + $0x38] sm:$0xff]  ;;  %p2884_p0 = scmp.lt.s32.totalorder %s3644_s21, %s2882_s25  ;;  %p2885_p1 = scmp.lt.s32.totalorder %s2883_s12, %s2877_s23 }
  0x1a   : > { %v336_v13 = vld [vmem:[%s320_s13 + $0x28] sm:$0xff]  ;;  %v337_v16 = vld [vmem:[%s320_s13 + $0x30] sm:$0xff]  ;;  %v339_v18 = vld [vmem:[%s320_s13 + $0x40] sm:$0xff]  ;;  %p2880_p13 = pneg %p2879_p12 }
  0x1b   : > { %v340_v17 = vld [vmem:[%s320_s13 + $0x48] sm:$0xff]  ;;  %v342_v19 = vld [vmem:[%s320_s13 + $0x58] sm:$0xff]  ;;  %v341_v20 = vld [vmem:[%s320_s13 + $0x50] sm:$0xff]  ;;  %p2886_p2 = por %p2885_p1, %p2884_p0 }
  0x1c   : > { %v343_v21 = vld [vmem:[%s320_s13 + $0x60] sm:$0xff]  ;;  %v728_v5 = vld [vmem:[%s3216_s22 + $0x8] sm:$0xff]  ;;  %v729_v7 = vld [vmem:[%s3216_s22 + $0x10] sm:$0xff] }
  0x1d   : > { %354 = vperm.xlu1 %2876, %v334_v10   ;;  %348 = vperm.xlu0 %2875, %v332_v11   ;;  %v727_v4 = vld [vmem:[%s3216_s22] sm:$0xff]  ;;  %v730_v8 = vld [vmem:[%s3216_s22 + $0x18] sm:$0xff]  ;;  %v732_v10 = vld [vmem:[%s3216_s22 + $0x28] sm:$0xff]  ;;  %p2887_p3 = pnand %p2886_p2, %p2880_p13 }
  0x1e   : > { %v731_v9 = vld [vmem:[%s3216_s22 + $0x20] sm:$0xff]  ;;  %v733_v11 = vld [vmem:[%s3216_s22 + $0x30] sm:$0xff] }
  0x21   : > { %360 = vperm.xlu1 %2876, %v336_v13   ;;  %357 = vperm.xlu0 %2875, %v335_v14   ;;  %v734_v13 = vld [vmem:[%s3216_s22 + $0x38] sm:$0xff]  ;;  %v735_v14 = vld [vmem:[%s3216_s22 + $0x40] sm:$0xff] }
  0x25   : > { %366 = vperm.xlu1 %2876, %v338_v15   ;;  %363 = vperm.xlu0 %2875, %v337_v16   ;;  %v736_v15 = vld [vmem:[%s3216_s22 + $0x48] sm:$0xff]  ;;  %v737_v16 = vld [vmem:[%s3216_s22 + $0x50] sm:$0xff] }
  0x29   : > { %372 = vperm.xlu1 %2876, %v340_v17   ;;  %369 = vperm.xlu0 %2875, %v339_v18   ;;  %v738_v17 = vld [vmem:[%s3216_s22 + $0x58] sm:$0xff]  ;;  %v739_v18 = vld [vmem:[%s3216_s22 + $0x60] sm:$0xff] }
  0x2d   : > { %378 = vperm.xlu1 %2876, %v342_v19   ;;  %375 = vperm.xlu0 %2875, %v341_v20   ;;  %v2060_v19 = vld [vmem:[%s3694_s4 + $0x40] sm:$0xff]  ;;  %v2061_v20 = vld [vmem:[%s3694_s4 + $0x48] sm:$0xff] }
  0x2e   : > { %v2730_v22 = vpack.c.bf16 %v2061_v20, %v2060_v19  ;;  %v3375_v20 = vld [vmem:[%s3695_s5] ss:$0 sm:$0xff] }
  0x31   : > { %381 = vperm.xlu0 %2875, %v343_v21   ;;  %v2062_v21 = vld [vmem:[%s3694_s4 + $0x50] sm:$0xff] }
  0x98   : > { %v346_v28 = vpop.permute.xlu0 %345  ;;  %v352_v36 = vpop.permute.xlu1 %351 }
  0x99   : > { %vm383_vm2 = vcmp.eq.s32.totalorder %v346_v28, %v3070_v23  ;;  %vm385_vm3 = vcmp.eq.s32.totalorder %v352_v36, %v3070_v23  ;;  %v2066_v28 = vld [vmem:[%s3694_s4 + $0x70] sm:$0xff] }
  0x9a   : > { %v1992_v30 = vsel %vm383_vm2, 1.0, %v2944_v12  ;;  %v1994_v43 = vsel %vm385_vm3, 1.0, %v2944_v12 }
  0x9b   : > { %2302 = vmatmul.mubr.msk.f32.vlgmr.msra.gmra.mrb[0].mxu0 %vm424_vm1, %v1992_v30  ;;  %2345 = vmatmul.mubr.msk.f32.vlgmr.msra.gmra.mrb[0].mxu1 %vm424_vm1, %v1992_v30 }
  0x9c   : > { %2713 = vmatpush3.bf16.msra.mxu0 %v2712_v29  ;;  %v349_v37 = vpop.permute.xlu0 %348  ;;  %2304 = vmatprep.mubr.msk.f32.mxu0 %vm2943_vm0, %v2944_v12  ;;  %v355_v44 = vpop.permute.xlu1 %354  ;;  %v2067_v29 = vld [vmem:[%s3694_s4 + $0x78] sm:$0xff] }
  0x9d   : > { %vm384_vm4 = vcmp.eq.s32.totalorder %v349_v37, %v3070_v23  ;;  %2347 = vmatprep.mubr.msk.f32.mxu1 %vm2943_vm0, %v2944_v12  ;;  %2714 = vmatprep.subr.bf16.mxu0 %v2942_v6  ;;  %vm386_vm5 = vcmp.eq.s32.totalorder %v355_v44, %v3070_v23  ;;  %v2739_v30 = vpack.c.bf16 %v2067_v29, %v2066_v28 }
  0x9e   : > { %v1993_v39 = vsel %vm384_vm4, 1.0, %v2944_v12  ;;  %2719 = vmatpush3.bf16.msra.mxu1 %v2718_v33  ;;  %v1995_v49 = vsel %vm386_vm5, 1.0, %v2944_v12 }
  0x9f   : > { %2305 = vmatmul.mubr.msk.f32.gmra.mrb[2].mxu0 %vm424_vm1, %v1993_v39  ;;  %2348 = vmatmul.mubr.msk.f32.gmra.mrb[2].mxu1 %vm424_vm1, %v1993_v39 }
  0xa0   : > { %2307 = vmatprep.mubr.msk.f32.mxu0 %vm2943_vm0, %v2944_v12  ;;  %2350 = vmatprep.mubr.msk.f32.mxu1 %vm2943_vm0, %v2944_v12  ;;  %v358_v48 = vpop.permute.xlu0 %357  ;;  %v361_v51 = vpop.permute.xlu1 %360 }
  0xa1   : > { %2716 = vmatpush3.bf16.msra.mxu0 %v2715_v38  ;;  %2720 = vmatprep.subr.bf16.mxu1 %v2942_v6  ;;  %vm387_vm6 = vcmp.eq.s32.totalorder %v358_v48, %v3070_v23  ;;  %vm388_vm7 = vcmp.eq.s32.totalorder %v361_v51, %v3070_v23 }
  0xa2   : > { %2722 = vmatpush3.bf16.msra.mxu1 %v2721_v40  ;;  %2729 = vmatprep.subr.bf16.mxu0 %v2942_v6  ;;  %v1996_v52 = vsel %vm387_vm6, 1.0, %v2944_v12  ;;  %v1997_v54 = vsel %vm388_vm7, 1.0, %v2944_v12 }
  0xa3   : > { %2308 = vmatmul.mubr.msk.f32.gmra.mrb[4].mxu0 %vm424_vm1, %v1994_v43  ;;  %2351 = vmatmul.mubr.msk.f32.gmra.mrb[4].mxu1 %vm424_vm1, %v1994_v43 }
  0xa4   : > { %2310 = vmatprep.mubr.msk.f32.mxu0 %vm2943_vm0, %v2944_v12  ;;  %2353 = vmatprep.mubr.msk.f32.mxu1 %vm2943_vm0, %v2944_v12  ;;  %v364_v53 = vpop.permute.xlu0 %363  ;;  %v367_v55 = vpop.permute.xlu1 %366 }
  0xa5   : > { %2723 = vmatprep.subr.bf16.mxu1 %v2942_v6  ;;  %vm389_vm8 = vcmp.eq.s32.totalorder %v364_v53, %v3070_v23  ;;  %vm390_vm9 = vcmp.eq.s32.totalorder %v367_v55, %v3070_v23 }
  0xa6   : > { %2725 = vmatpush3.bf16.msra.mxu1 %v2724_v45  ;;  %v1998_v56 = vsel %vm389_vm8, 1.0, %v2944_v12  ;;  %v1999_v58 = vsel %vm390_vm9, 1.0, %v2944_v12 }
  0xa7   : > { %2311 = vmatmul.mubr.msk.f32.gmra.mrb[6].mxu0 %vm424_vm1, %v1995_v49  ;;  %2354 = vmatmul.mubr.msk.f32.gmra.mrb[6].mxu1 %vm424_vm1, %v1995_v49 }
  0xa8   : > { %2313 = vmatprep.mubr.msk.f32.mxu0 %vm2943_vm0, %v2944_v12  ;;  %2356 = vmatprep.mubr.msk.f32.mxu1 %vm2943_vm0, %v2944_v12  ;;  %v370_v57 = vpop.permute.xlu0 %369  ;;  %v373_v59 = vpop.permute.xlu1 %372 }
  0xa9   : > { %2726 = vmatprep.subr.bf16.mxu1 %v2942_v6  ;;  %vm391_vm10 = vcmp.eq.s32.totalorder %v370_v57, %v3070_v23  ;;  %vm392_vm11 = vcmp.eq.s32.totalorder %v373_v59, %v3070_v23 }
  0xaa   : > { %2728 = vmatpush3.bf16.msra.mxu1 %v2727_v50  ;;  %v2000_v60 = vsel %vm391_vm10, 1.0, %v2944_v12  ;;  %v2001_v62 = vsel %vm392_vm11, 1.0, %v2944_v12 }
  0xab   : > { %2314 = vmatmul.mubr.msk.f32.gmra.mrb[8].mxu0 %vm424_vm1, %v1996_v52  ;;  %2357 = vmatmul.mubr.msk.f32.gmra.mrb[8].mxu1 %vm424_vm1, %v1996_v52 }
  0xac   : > { %2316 = vmatprep.mubr.msk.f32.mxu0 %vm2943_vm0, %v2944_v12  ;;  %2359 = vmatprep.mubr.msk.f32.mxu1 %vm2943_vm0, %v2944_v12  ;;  %v376_v61 = vpop.permute.xlu0 %375  ;;  %v379_v63 = vpop.permute.xlu1 %378 }
  0xad   : > { %2741 = vmatprep.subr.bf16.mxu1 %v2942_v6  ;;  %vm393_vm12 = vcmp.eq.s32.totalorder %v376_v61, %v3070_v23  ;;  %vm394_vm13 = vcmp.eq.s32.totalorder %v379_v63, %v3070_v23 }
  0xae   : > { %v2002_v0 = vsel %vm393_vm12, 1.0, %v2944_v12  ;;  %v2003_v2 = vsel %vm394_vm13, 1.0, %v2944_v12 }
  0xaf   : > { %2317 = vmatmul.mubr.msk.f32.gmra.mrb[10].mxu0 %vm424_vm1, %v1997_v54  ;;  %2360 = vmatmul.mubr.msk.f32.gmra.mrb[10].mxu1 %vm424_vm1, %v1997_v54 }
  0xb0   : > { %2319 = vmatprep.mubr.msk.f32.mxu0 %vm2943_vm0, %v2944_v12  ;;  %2362 = vmatprep.mubr.msk.f32.mxu1 %vm2943_vm0, %v2944_v12  ;;  %v382_v1 = vpop.permute.xlu0 %381 }
  0xb1   : > { %vm395_vm14 = vcmp.eq.s32.totalorder %v382_v1, %v3070_v23  ;;  %v2063_v23 = vld [vmem:[%s3694_s4 + $0x58] sm:$0xff] }
  0xb2   : > { %v2004_v3 = vsel %vm395_vm14, 1.0, %v2944_v12  ;;  %v2733_v24 = vpack.c.bf16 %v2063_v23, %v2062_v21 }
  0xb3   : > { %2320 = vmatmul.mubr.msk.f32.gmra.mrb[12].mxu0 %vm424_vm1, %v1998_v56  ;;  %2363 = vmatmul.mubr.msk.f32.gmra.mrb[12].mxu1 %vm424_vm1, %v1998_v56 }
  0xb4   : > { %2322 = vmatprep.mubr.msk.f32.mxu0 %vm2943_vm0, %v2944_v12  ;;  %2365 = vmatprep.mubr.msk.f32.mxu1 %vm2943_vm0, %v2944_v12 }
  0xb7   : > { %2323 = vmatmul.mubr.msk.f32.gmra.mrb[14].mxu0 %vm424_vm1, %v1999_v58  ;;  %2366 = vmatmul.mubr.msk.f32.gmra.mrb[14].mxu1 %vm424_vm1, %v1999_v58 }
  0xb8   : > { %2325 = vmatprep.mubr.msk.f32.mxu0 %vm2943_vm0, %v2944_v12  ;;  %2368 = vmatprep.mubr.msk.f32.mxu1 %vm2943_vm0, %v2944_v12 }
  0xbb   : > { %2326 = vmatmul.mubr.msk.f32.gmra.mrb[16].mxu0 %vm424_vm1, %v2000_v60  ;;  %2369 = vmatmul.mubr.msk.f32.gmra.mrb[16].mxu1 %vm424_vm1, %v2000_v60 }
  0xbc   : > { %2328 = vmatprep.mubr.msk.f32.mxu0 %vm2943_vm0, %v2944_v12  ;;  %2371 = vmatprep.mubr.msk.f32.mxu1 %vm2943_vm0, %v2944_v12 }
  0xbf   : > { %2329 = vmatmul.mubr.msk.f32.gmra.mrb[18].mxu0 %vm424_vm1, %v2001_v62  ;;  %2372 = vmatmul.mubr.msk.f32.gmra.mrb[18].mxu1 %vm424_vm1, %v2001_v62 }
  0xc0   : > { %2331 = vmatprep.mubr.msk.f32.mxu0 %vm2943_vm0, %v2944_v12  ;;  %2374 = vmatprep.mubr.msk.f32.mxu1 %vm2943_vm0, %v2944_v12 }
  0xc3   : > { %2332 = vmatmul.mubr.msk.f32.gmra.mrb[20].mxu0 %vm424_vm1, %v2002_v0  ;;  %2375 = vmatmul.mubr.msk.f32.gmra.mrb[20].mxu1 %vm424_vm1, %v2002_v0 }
  0xc4   : > { %2334 = vmatprep.mubr.msk.f32.mxu0 %vm2943_vm0, %v2944_v12  ;;  %2377 = vmatprep.mubr.msk.f32.mxu1 %vm2943_vm0, %v2944_v12 }
  0xc7   : > { %2335 = vmatmul.mubr.msk.f32.gmra.mrb[22].mxu0 %vm424_vm1, %v2003_v2  ;;  %2378 = vmatmul.mubr.msk.f32.gmra.mrb[22].mxu1 %vm424_vm1, %v2003_v2 }
  0xc8   : > { %2337 = vmatprep.mubr.msk.f32.mxu0 %vm2943_vm0, %v2944_v12  ;;  %2380 = vmatprep.mubr.msk.f32.mxu1 %vm2943_vm0, %v2944_v12 }
  0xcb   : > { %2338 = vmatmul.mubr.msk.f32.gmra.mrb[24].mxu0 %vm424_vm1, %v2004_v3  ;;  %2381 = vmatmul.mubr.msk.f32.gmra.mrb[24].mxu1 %vm424_vm1, %v2004_v3  ;;  %vm942_vm1 = vcmask 523264  }
  0xcc   : > { %2391 = vmatprep.mubr.msk.f32.mxu0 %vm2943_vm0, %v2944_v12  ;;  %2446 = vmatprep.mubr.msk.f32.mxu1 %vm2943_vm0, %v2944_v12 }
  0xcf   : > { %2392 = vmatmul.mubr.msk.f32.vlgmr.msra.gmra.mrb[0].mxu0 %vm744_vm15, %v727_v4 }
  0xd0   : > { %2394 = vmatprep.mubr.msk.f32.mxu0 %vm2943_vm0, %v2944_v12  ;;  %2731 = vmatpush3.bf16.msra.mxu0 %v2730_v22 }
  0xd1   : > { %2732 = vmatprep.subr.bf16.mxu0 %v2942_v6 }
  0xd3   : > { %2395 = vmatmul.mubr.msk.f32.gmra.mrb[2].mxu0 %vm744_vm15, %v728_v5 }
  0xd4   : > { %2397 = vmatprep.mubr.msk.f32.mxu0 %vm2943_vm0, %v2944_v12  ;;  %2734 = vmatpush3.bf16.msra.mxu0 %v2733_v24 }
  0xd5   : > { %2735 = vmatprep.subr.bf16.mxu0 %v2942_v6 }
  0xd7   : > { %2398 = vmatmul.mubr.msk.f32.gmra.mrb[4].mxu0 %vm744_vm15, %v729_v7  ;;  %v2083_v7 = vld [vmem:[%s3694_s4 + $0x80] sm:$0xff] }
  0xd8   : > { %2400 = vmatprep.mubr.msk.f32.mxu0 %vm2943_vm0, %v2944_v12  ;;  %2737 = vmatpush3.bf16.msra.mxu0 %v2736_v27 }
  0xd9   : > { %2738 = vmatprep.subr.bf16.mxu0 %v2942_v6 }
  0xdb   : > { %2401 = vmatmul.mubr.msk.f32.gmra.mrb[6].mxu0 %vm744_vm15, %v730_v8  ;;  %v2084_v8 = vld [vmem:[%s3694_s4 + $0x88] sm:$0xff] }
  0xdc   : > { %2403 = vmatprep.mubr.msk.f32.mxu0 %vm2943_vm0, %v2944_v12  ;;  %2740 = vmatpush3.bf16.msra.mxu0 %v2739_v30 }
  0xdd   : > { %2753 = vmatprep.subr.bf16.mxu0 %v2942_v6 }
  0xdf   : > { %2404 = vmatmul.mubr.msk.f32.gmra.mrb[8].mxu0 %vm744_vm15, %v731_v9  ;;  %v2085_v9 = vld [vmem:[%s3694_s4 + $0x90] sm:$0xff] }
  0xe0   : > { %2406 = vmatprep.mubr.msk.f32.mxu0 %vm2943_vm0, %v2944_v12 }
  0xe3   : > { %2407 = vmatmul.mubr.msk.f32.gmra.mrb[10].mxu0 %vm744_vm15, %v732_v10  ;;  %v2742_v10 = vpack.c.bf16 %v2084_v8, %v2083_v7 }
  0xe4   : > { %2409 = vmatprep.mubr.msk.f32.mxu0 %vm2943_vm0, %v2944_v12 }
  0xe7   : > { %2410 = vmatmul.mubr.msk.f32.gmra.mrb[12].mxu0 %vm744_vm15, %v733_v11  ;;  %v2086_v11 = vld [vmem:[%s3694_s4 + $0x98] sm:$0xff] }
  0xe8   : > { %2412 = vmatprep.mubr.msk.f32.mxu0 %vm2943_vm0, %v2944_v12 }
  0xeb   : > { %2413 = vmatmul.mubr.msk.f32.gmra.mrb[14].mxu0 %vm744_vm15, %v734_v13  ;;  %v2745_v13 = vpack.c.bf16 %v2086_v11, %v2085_v9  ;;  %v2105_v11 = vld [vmem:[%s3694_s4 + $0xc8] sm:$0xff] }
  0xec   : > { %2415 = vmatprep.mubr.msk.f32.mxu0 %vm2943_vm0, %v2944_v12 }
  0xef   : > { %2416 = vmatmul.mubr.msk.f32.gmra.mrb[16].mxu0 %vm744_vm15, %v735_v14  ;;  %v2087_v14 = vld [vmem:[%s3694_s4 + $0xa0] sm:$0xff] }
  0xf0   : > { %2418 = vmatprep.mubr.msk.f32.mxu0 %vm2943_vm0, %v2944_v12 }
  0xf3   : > { %2419 = vmatmul.mubr.msk.f32.gmra.mrb[18].mxu0 %vm744_vm15, %v736_v15  ;;  %v2088_v15 = vld [vmem:[%s3694_s4 + $0xa8] sm:$0xff] }
  0xf4   : > { %2421 = vmatprep.mubr.msk.f32.mxu0 %vm2943_vm0, %v2944_v12 }
  0xf7   : > { %2422 = vmatmul.mubr.msk.f32.gmra.mrb[20].mxu0 %vm744_vm15, %v737_v16  ;;  %v2748_v16 = vpack.c.bf16 %v2088_v15, %v2087_v14  ;;  %v2107_v15 = vld [vmem:[%s3694_s4 + $0xd8] sm:$0xff] }
  0xf8   : > { %2424 = vmatprep.mubr.msk.f32.mxu0 %vm2943_vm0, %v2944_v12 }
  0xfb   : > { %2425 = vmatmul.mubr.msk.f32.gmra.mrb[22].mxu0 %vm744_vm15, %v738_v17  ;;  %v2089_v17 = vld [vmem:[%s3694_s4 + $0xb0] sm:$0xff] }
  0xfc   : > { %2427 = vmatprep.mubr.msk.f32.mxu0 %vm2943_vm0, %v2944_v12 }
  0xff   : > { %2428 = vmatmul.mubr.msk.f32.gmra.mrb[24].mxu0 %vm744_vm15, %v739_v18  ;;  %v2090_v18 = vld [vmem:[%s3694_s4 + $0xb8] sm:$0xff] }
 0x100   : > { %2501 = vmatprep.mubr.msk.f32.mxu0 %vm2943_vm0, %v2944_v12  ;;  %v2751_v19 = vpack.c.bf16 %v2090_v18, %v2089_v17  ;;  %v2108_v17 = vld [vmem:[%s3694_s4 + $0xe0] sm:$0xff]  ;;  %v2109_v18 = vld [vmem:[%s3694_s4 + $0xe8] sm:$0xff] }
 0x1a2   : > { %v850_v31 = vpop.f32.mrb[0].mxu0 }
 0x1a3   : > { %v914_v32 = vmax.f32 %v850_v31, 0.0  ;;  %v2393_v33 = vpop.f32.mrb[1].mxu0 }
 0x1a5   : > { %2447 = vmatmul.mubr.msk.f32.vlgmr.msra.gmra.mrb[26].mxu1 %vm942_vm1, %v914_v32 }
 0x1a6   : > { %v855_v34 = vpop.f32.mrb[2].mxu0  ;;  %2449 = vmatprep.mubr.msk.f32.mxu1 %vm2943_vm0, %v2944_v12  ;;  %2743 = vmatpush3.bf16.msra.mxu1 %v2742_v10  ;;  %v2104_v10 = vld [vmem:[%s3694_s4 + $0xc0] sm:$0xff] }
 0x1a7   : > { %v915_v35 = vmax.f32 %v855_v34, 0.0  ;;  %v2396_v36 = vpop.f32.mrb[3].mxu0  ;;  %2744 = vmatprep.subr.bf16.mxu1 %v2942_v6  ;;  %v2754_v14 = vpack.c.bf16 %v2105_v11, %v2104_v10  ;;  %v1708_v10 = vld [vmem:[%s3696_s6 + $0x38] sm:$0xff] }
 0x1a9   : > { %2450 = vmatmul.mubr.msk.f32.gmra.mrb[28].mxu1 %vm942_vm1, %v915_v35 }
 0x1aa   : > { %v860_v37 = vpop.f32.mrb[4].mxu0  ;;  %2452 = vmatprep.mubr.msk.f32.mxu1 %vm2943_vm0, %v2944_v12  ;;  %2746 = vmatpush3.bf16.msra.mxu1 %v2745_v13  ;;  %v2106_v13 = vld [vmem:[%s3694_s4 + $0xd0] sm:$0xff] }
 0x1ab   : > { %v916_v38 = vmax.f32 %v860_v37, 0.0  ;;  %v2399_v39 = vpop.f32.mrb[5].mxu0  ;;  %2747 = vmatprep.subr.bf16.mxu1 %v2942_v6 }
 0x1ad   : > { %2453 = vmatmul.mubr.msk.f32.gmra.mrb[30].mxu1 %vm942_vm1, %v916_v38 }
 0x1ae   : > { %v865_v40 = vpop.f32.mrb[6].mxu0  ;;  %2455 = vmatprep.mubr.msk.f32.mxu1 %vm2943_vm0, %v2944_v12  ;;  %2749 = vmatpush3.bf16.msra.mxu1 %v2748_v16  ;;  %v2757_v16 = vpack.c.bf16 %v2107_v15, %v2106_v13 }
 0x1af   : > { %v917_v41 = vmax.f32 %v865_v40, 0.0  ;;  %v2402_v42 = vpop.f32.mrb[7].mxu0  ;;  %2750 = vmatprep.subr.bf16.mxu1 %v2942_v6 }
 0x1b1   : > { %2456 = vmatmul.mubr.msk.f32.gmra.mrb[32].mxu1 %vm942_vm1, %v917_v41 }
 0x1b2   : > { %v870_v43 = vpop.f32.mrb[8].mxu0  ;;  %2458 = vmatprep.mubr.msk.f32.mxu1 %vm2943_vm0, %v2944_v12  ;;  %2752 = vmatpush3.bf16.msra.mxu1 %v2751_v19  ;;  %v2760_v19 = vpack.c.bf16 %v2109_v18, %v2108_v17 }
 0x1b3   : > { %v918_v44 = vmax.f32 %v870_v43, 0.0  ;;  %v2405_v45 = vpop.f32.mrb[9].mxu0  ;;  %2765 = vmatprep.subr.bf16.mxu1 %v2942_v6 }
 0x1b5   : > { %2459 = vmatmul.mubr.msk.f32.gmra.mrb[34].mxu1 %vm942_vm1, %v918_v44 }
 0x1b6   : > { %v875_v46 = vpop.f32.mrb[10].mxu0  ;;  %2461 = vmatprep.mubr.msk.f32.mxu1 %vm2943_vm0, %v2944_v12 }
 0x1b7   : > { %v919_v47 = vmax.f32 %v875_v46, 0.0  ;;  %v2408_v48 = vpop.f32.mrb[11].mxu0 }
 0x1b9   : > { %2462 = vmatmul.mubr.msk.f32.gmra.mrb[36].mxu1 %vm942_vm1, %v919_v47 }
 0x1ba   : > { %v880_v49 = vpop.f32.mrb[12].mxu0  ;;  %2464 = vmatprep.mubr.msk.f32.mxu1 %vm2943_vm0, %v2944_v12 }
 0x1bb   : > { %v920_v50 = vmax.f32 %v880_v49, 0.0  ;;  %v2411_v51 = vpop.f32.mrb[13].mxu0 }
 0x1bd   : > { %2465 = vmatmul.mubr.msk.f32.gmra.mrb[38].mxu1 %vm942_vm1, %v920_v50 }
 0x1be   : > { %v885_v52 = vpop.f32.mrb[14].mxu0  ;;  %2467 = vmatprep.mubr.msk.f32.mxu1 %vm2943_vm0, %v2944_v12 }
 0x1bf   : > { %v921_v53 = vmax.f32 %v885_v52, 0.0  ;;  %v2414_v54 = vpop.f32.mrb[15].mxu0 }
 0x1c1   : > { %2468 = vmatmul.mubr.msk.f32.gmra.mrb[40].mxu1 %vm942_vm1, %v921_v53 }
 0x1c2   : > { %v890_v55 = vpop.f32.mrb[16].mxu0  ;;  %2470 = vmatprep.mubr.msk.f32.mxu1 %vm2943_vm0, %v2944_v12 }
 0x1c3   : > { %v922_v56 = vmax.f32 %v890_v55, 0.0  ;;  %v2417_v57 = vpop.f32.mrb[17].mxu0 }
 0x1c5   : > { %2471 = vmatmul.mubr.msk.f32.gmra.mrb[42].mxu1 %vm942_vm1, %v922_v56 }
 0x1c6   : > { %v895_v58 = vpop.f32.mrb[18].mxu0  ;;  %2473 = vmatprep.mubr.msk.f32.mxu1 %vm2943_vm0, %v2944_v12 }
 0x1c7   : > { %v923_v59 = vmax.f32 %v895_v58, 0.0  ;;  %v2420_v60 = vpop.f32.mrb[19].mxu0 }
 0x1c9   : > { %2474 = vmatmul.mubr.msk.f32.gmra.mrb[44].mxu1 %vm942_vm1, %v923_v59 }
 0x1ca   : > { %v900_v61 = vpop.f32.mrb[20].mxu0  ;;  %2476 = vmatprep.mubr.msk.f32.mxu1 %vm2943_vm0, %v2944_v12 }
 0x1cb   : > { %v924_v62 = vmax.f32 %v900_v61, 0.0  ;;  %v2423_v63 = vpop.f32.mrb[21].mxu0 }
 0x1cd   : > { %2477 = vmatmul.mubr.msk.f32.gmra.mrb[46].mxu1 %vm942_vm1, %v924_v62 }
 0x1ce   : > { %v905_v0 = vpop.f32.mrb[22].mxu0  ;;  %2479 = vmatprep.mubr.msk.f32.mxu1 %vm2943_vm0, %v2944_v12 }
 0x1cf   : > { %v925_v1 = vmax.f32 %v905_v0, 0.0  ;;  %v2426_v2 = vpop.f32.mrb[23].mxu0 }
 0x1d1   : > { %2480 = vmatmul.mubr.msk.f32.gmra.mrb[48].mxu1 %vm942_vm1, %v925_v1 }
 0x1d2   : > { %v910_v3 = vpop.f32.mrb[24].mxu0  ;;  %2482 = vmatprep.mubr.msk.f32.mxu1 %vm2943_vm0, %v2944_v12 }
 0x1d3   : > { %v926_v4 = vmax.f32 %v910_v3, 0.0  ;;  %v2429_v5 = vpop.f32.mrb[25].mxu0 }
 0x1d5   : > { %2483 = vmatmul.mubr.msk.f32.gmra.mrb[50].mxu1 %vm942_vm1, %v926_v4 }
 0x1d6   : > { %2556 = vmatprep.mubr.msk.f32.mxu1 %vm2943_vm0, %v2944_v12 }
 0x278   : > { %v1048_v21 = vpop.f32.mrb[26].mxu1 }
 0x279   : > { %v1049_v22 = vadd.f32 %v3375_v20, %v1048_v21  ;;  %v2448_v23 = vpop.f32.mrb[27].mxu1  ;;  %v2111_v21 = vld [vmem:[%s3694_s4 + $0xf8] sm:$0xff] }
 0x27a   : > { %v2069_v23 = vld [vmem:[%s3695_s5 + $0x1] ss:$0 sm:$0xff] }
 0x27b   : > { %v1112_v24 = vmax.f32 %v1049_v22, 0.0 }
 0x27c   : > { %v1053_v25 = vpop.f32.mrb[28].mxu1 }
 0x27d   : > { %v1054_v26 = vadd.f32 %v3375_v20, %v1053_v25  ;;  %v2451_v27 = vpop.f32.mrb[29].mxu1  ;;  %2502 = vmatmul.mubr.msk.f32.vlgmr.msra.gmra.mrb[26].mxu0 %vm942_vm1, %v1112_v24 }
 0x27e   : > { %2504 = vmatprep.mubr.msk.f32.mxu0 %vm2943_vm0, %v2944_v12  ;;  %2755 = vmatpush3.bf16.msra.mxu0 %v2754_v14 }
 0x27f   : > { %v1113_v28 = vmax.f32 %v1054_v26, 0.0  ;;  %2756 = vmatprep.subr.bf16.mxu0 %v2942_v6 }
 0x280   : > { %v1058_v29 = vpop.f32.mrb[30].mxu1 }
 0x281   : > { %v1059_v30 = vadd.f32 %v3375_v20, %v1058_v29  ;;  %v2454_v31 = vpop.f32.mrb[31].mxu1  ;;  %2505 = vmatmul.mubr.msk.f32.gmra.mrb[28].mxu0 %vm942_vm1, %v1113_v28 }
 0x282   : > { %2507 = vmatprep.mubr.msk.f32.mxu0 %vm2943_vm0, %v2944_v12  ;;  %2758 = vmatpush3.bf16.msra.mxu0 %v2757_v16 }
 0x283   : > { %v1114_v32 = vmax.f32 %v1059_v30, 0.0  ;;  %2759 = vmatprep.subr.bf16.mxu0 %v2942_v6 }
 0x284   : > { %v1063_v33 = vpop.f32.mrb[32].mxu1 }
 0x285   : > { %v1064_v34 = vadd.f32 %v3375_v20, %v1063_v33  ;;  %v2457_v35 = vpop.f32.mrb[33].mxu1  ;;  %2508 = vmatmul.mubr.msk.f32.gmra.mrb[30].mxu0 %vm942_vm1, %v1114_v32 }
 0x286   : > { %2510 = vmatprep.mubr.msk.f32.mxu0 %vm2943_vm0, %v2944_v12  ;;  %2761 = vmatpush3.bf16.msra.mxu0 %v2760_v19 }
 0x287   : > { %v1115_v36 = vmax.f32 %v1064_v34, 0.0  ;;  %2762 = vmatprep.subr.bf16.mxu0 %v2942_v6 }
 0x288   : > { %v1068_v37 = vpop.f32.mrb[34].mxu1 }
 0x289   : > { %v1069_v38 = vadd.f32 %v3375_v20, %v1068_v37  ;;  %v2460_v39 = vpop.f32.mrb[35].mxu1  ;;  %2511 = vmatmul.mubr.msk.f32.gmra.mrb[32].mxu0 %vm942_vm1, %v1115_v36 }
 0x28a   : > { %2513 = vmatprep.mubr.msk.f32.mxu0 %vm2943_vm0, %v2944_v12 }
 0x28b   : > { %v1116_v40 = vmax.f32 %v1069_v38, 0.0 }
 0x28c   : > { %v1073_v41 = vpop.f32.mrb[36].mxu1 }
 0x28d   : > { %v1074_v42 = vadd.f32 %v3375_v20, %v1073_v41  ;;  %v2463_v43 = vpop.f32.mrb[37].mxu1  ;;  %2514 = vmatmul.mubr.msk.f32.gmra.mrb[34].mxu0 %vm942_vm1, %v1116_v40 }
 0x28e   : > { %2516 = vmatprep.mubr.msk.f32.mxu0 %vm2943_vm0, %v2944_v12 }
 0x28f   : > { %v1117_v44 = vmax.f32 %v1074_v42, 0.0 }
 0x290   : > { %v1078_v45 = vpop.f32.mrb[38].mxu1 }
 0x291   : > { %v1079_v46 = vadd.f32 %v3375_v20, %v1078_v45  ;;  %v2466_v47 = vpop.f32.mrb[39].mxu1  ;;  %2517 = vmatmul.mubr.msk.f32.gmra.mrb[36].mxu0 %vm942_vm1, %v1117_v44 }
 0x292   : > { %2519 = vmatprep.mubr.msk.f32.mxu0 %vm2943_vm0, %v2944_v12 }
 0x293   : > { %v1118_v48 = vmax.f32 %v1079_v46, 0.0 }
 0x294   : > { %v1083_v49 = vpop.f32.mrb[40].mxu1 }
 0x295   : > { %v1084_v50 = vadd.f32 %v3375_v20, %v1083_v49  ;;  %v2469_v51 = vpop.f32.mrb[41].mxu1  ;;  %2520 = vmatmul.mubr.msk.f32.gmra.mrb[38].mxu0 %vm942_vm1, %v1118_v48 }
 0x296   : > { %2522 = vmatprep.mubr.msk.f32.mxu0 %vm2943_vm0, %v2944_v12 }
 0x297   : > { %v1119_v52 = vmax.f32 %v1084_v50, 0.0 }
 0x298   : > { %v1088_v53 = vpop.f32.mrb[42].mxu1 }
 0x299   : > { %v1089_v54 = vadd.f32 %v3375_v20, %v1088_v53  ;;  %v2472_v55 = vpop.f32.mrb[43].mxu1  ;;  %2523 = vmatmul.mubr.msk.f32.gmra.mrb[40].mxu0 %vm942_vm1, %v1119_v52 }
 0x29a   : > { %2525 = vmatprep.mubr.msk.f32.mxu0 %vm2943_vm0, %v2944_v12 }
 0x29b   : > { %v1120_v56 = vmax.f32 %v1089_v54, 0.0 }
 0x29c   : > { %v1093_v57 = vpop.f32.mrb[44].mxu1 }
 0x29d   : > { %v1094_v58 = vadd.f32 %v3375_v20, %v1093_v57  ;;  %v2475_v59 = vpop.f32.mrb[45].mxu1  ;;  %2526 = vmatmul.mubr.msk.f32.gmra.mrb[42].mxu0 %vm942_vm1, %v1120_v56 }
 0x29e   : > { %2528 = vmatprep.mubr.msk.f32.mxu0 %vm2943_vm0, %v2944_v12 }
 0x29f   : > { %v1121_v60 = vmax.f32 %v1094_v58, 0.0 }
 0x2a0   : > { %v1098_v61 = vpop.f32.mrb[46].mxu1 }
 0x2a1   : > { %v1099_v62 = vadd.f32 %v3375_v20, %v1098_v61  ;;  %v2478_v63 = vpop.f32.mrb[47].mxu1  ;;  %2529 = vmatmul.mubr.msk.f32.gmra.mrb[44].mxu0 %vm942_vm1, %v1121_v60 }
 0x2a2   : > { %2531 = vmatprep.mubr.msk.f32.mxu0 %vm2943_vm0, %v2944_v12  ;;  %v1701_v63 = vld [vmem:[%s3696_s6] sm:$0xff] }
 0x2a3   : > { %v1122_v0 = vmax.f32 %v1099_v62, 0.0 }
 0x2a4   : > { %v1103_v1 = vpop.f32.mrb[48].mxu1 }
 0x2a5   : > { %v1104_v2 = vadd.f32 %v3375_v20, %v1103_v1  ;;  %v2481_v3 = vpop.f32.mrb[49].mxu1  ;;  %2532 = vmatmul.mubr.msk.f32.gmra.mrb[46].mxu0 %vm942_vm1, %v1122_v0  ;;  %v1702_v0 = vld [vmem:[%s3696_s6 + $0x8] sm:$0xff]  ;;  %v1703_v1 = vld [vmem:[%s3696_s6 + $0x10] sm:$0xff] }
 0x2a6   : > { %2534 = vmatprep.mubr.msk.f32.mxu0 %vm2943_vm0, %v2944_v12  ;;  %v1704_v3 = vld [vmem:[%s3696_s6 + $0x18] sm:$0xff] }
 0x2a7   : > { %v1123_v4 = vmax.f32 %v1104_v2, 0.0  ;;  %v2766_v2 = vpack.c.bf16 %v1702_v0, %v1701_v63 }
 0x2a8   : > { %v1108_v5 = vpop.f32.mrb[50].mxu1 }
 0x2a9   : > { %v1109_v7 = vadd.f32 %v3375_v20, %v1108_v5  ;;  %v2484_v8 = vpop.f32.mrb[51].mxu1  ;;  %2535 = vmatmul.mubr.msk.f32.gmra.mrb[48].mxu0 %vm942_vm1, %v1123_v4  ;;  %v2110_v20 = vld [vmem:[%s3694_s4 + $0xf0] sm:$0xff]  ;;  %v2769_v4 = vpack.c.bf16 %v1704_v3, %v1703_v1  ;;  %v1705_v5 = vld [vmem:[%s3696_s6 + $0x20] sm:$0xff] }
 0x2aa   : > { %2537 = vmatprep.mubr.msk.f32.mxu0 %vm2943_vm0, %v2944_v12  ;;  %v2763_v22 = vpack.c.bf16 %v2111_v21, %v2110_v20 }
 0x2ab   : > { %v1124_v9 = vmax.f32 %v1109_v7, 0.0  ;;  %v1706_v7 = vld [vmem:[%s3696_s6 + $0x28] sm:$0xff] }
 0x2ac   : > { %2764 = vmatpush3.bf16.msra.mxu0 %v2763_v22  ;;  %v2772_v8 = vpack.c.bf16 %v1706_v7, %v1705_v5 }
 0x2ad   : > { %2538 = vmatmul.mubr.msk.f32.gmra.mrb[50].mxu0 %vm942_vm1, %v1124_v9  ;;  %v1707_v9 = vld [vmem:[%s3696_s6 + $0x30] sm:$0xff] }
 0x2ae   : > { %2611 = vmatprep.mubr.msk.f32.mxu0 %vm2943_vm0, %v2944_v12  ;;  %v2775_v11 = vpack.c.bf16 %v1708_v10, %v1707_v9 }
 0x350   : > { %v1247_v24 = vpop.f32.mrb[26].mxu0 }
 0x351   : > { %v1248_v25 = vadd.f32 %v2069_v23, %v1247_v24  ;;  %v2503_v26 = vpop.f32.mrb[27].mxu0 }
 0x353   : > { %2557 = vmatmul.mubr.msk.f32.vlgmr.msra.gmra.mrb[0].mxu1 %vm942_vm1, %v1248_v25 }
 0x354   : > { %v1252_v27 = vpop.f32.mrb[28].mxu0  ;;  %2559 = vmatprep.mubr.msk.f32.mxu1 %vm2943_vm0, %v2944_v12  ;;  %2767 = vmatpush3.bf16.msra.mxu1 %v2766_v2 }
 0x355   : > { %v1253_v28 = vadd.f32 %v2069_v23, %v1252_v27  ;;  %v2506_v29 = vpop.f32.mrb[29].mxu0  ;;  %2768 = vmatprep.subr.bf16.mxu1 %v2942_v6 }
 0x357   : > { %2560 = vmatmul.mubr.msk.f32.gmra.mrb[2].mxu1 %vm942_vm1, %v1253_v28 }
 0x358   : > { %v1257_v30 = vpop.f32.mrb[30].mxu0  ;;  %2562 = vmatprep.mubr.msk.f32.mxu1 %vm2943_vm0, %v2944_v12  ;;  %2770 = vmatpush3.bf16.msra.mxu1 %v2769_v4 }
 0x359   : > { %v1258_v31 = vadd.f32 %v2069_v23, %v1257_v30  ;;  %v2509_v32 = vpop.f32.mrb[31].mxu0  ;;  %2771 = vmatprep.subr.bf16.mxu1 %v2942_v6 }
 0x35b   : > { %2563 = vmatmul.mubr.msk.f32.gmra.mrb[4].mxu1 %vm942_vm1, %v1258_v31 }
 0x35c   : > { %v1262_v33 = vpop.f32.mrb[32].mxu0  ;;  %2565 = vmatprep.mubr.msk.f32.mxu1 %vm2943_vm0, %v2944_v12  ;;  %2773 = vmatpush3.bf16.msra.mxu1 %v2772_v8 }
 0x35d   : > { %v1263_v34 = vadd.f32 %v2069_v23, %v1262_v33  ;;  %v2512_v35 = vpop.f32.mrb[33].mxu0  ;;  %2774 = vmatprep.subr.bf16.mxu1 %v2942_v6 }
 0x35f   : > { %2566 = vmatmul.mubr.msk.f32.gmra.mrb[6].mxu1 %vm942_vm1, %v1263_v34 }
 0x360   : > { %v1267_v36 = vpop.f32.mrb[34].mxu0  ;;  %2568 = vmatprep.mubr.msk.f32.mxu1 %vm2943_vm0, %v2944_v12  ;;  %2776 = vmatpush3.bf16.msra.mxu1 %v2775_v11 }
 0x361   : > { %v1268_v37 = vadd.f32 %v2069_v23, %v1267_v36  ;;  %v2515_v38 = vpop.f32.mrb[35].mxu0 }
 0x363   : > { %2569 = vmatmul.mubr.msk.f32.gmra.mrb[8].mxu1 %vm942_vm1, %v1268_v37 }
 0x364   : > { %v1272_v39 = vpop.f32.mrb[36].mxu0  ;;  %2571 = vmatprep.mubr.msk.f32.mxu1 %vm2943_vm0, %v2944_v12 }
 0x365   : > { %v1273_v40 = vadd.f32 %v2069_v23, %v1272_v39  ;;  %v2518_v41 = vpop.f32.mrb[37].mxu0 }
 0x367   : > { %2572 = vmatmul.mubr.msk.f32.gmra.mrb[10].mxu1 %vm942_vm1, %v1273_v40 }
 0x368   : > { %v1277_v42 = vpop.f32.mrb[38].mxu0  ;;  %2574 = vmatprep.mubr.msk.f32.mxu1 %vm2943_vm0, %v2944_v12 }
 0x369   : > { %v1278_v43 = vadd.f32 %v2069_v23, %v1277_v42  ;;  %v2521_v44 = vpop.f32.mrb[39].mxu0 }
 0x36b   : > { %2575 = vmatmul.mubr.msk.f32.gmra.mrb[12].mxu1 %vm942_vm1, %v1278_v43 }
 0x36c   : > { %v1282_v45 = vpop.f32.mrb[40].mxu0  ;;  %2577 = vmatprep.mubr.msk.f32.mxu1 %vm2943_vm0, %v2944_v12 }
 0x36d   : > { %v1283_v46 = vadd.f32 %v2069_v23, %v1282_v45  ;;  %v2524_v47 = vpop.f32.mrb[41].mxu0 }
 0x36f   : > { %2578 = vmatmul.mubr.msk.f32.gmra.mrb[14].mxu1 %vm942_vm1, %v1283_v46 }
 0x370   : > { %v1287_v48 = vpop.f32.mrb[42].mxu0  ;;  %2580 = vmatprep.mubr.msk.f32.mxu1 %vm2943_vm0, %v2944_v12 }
 0x371   : > { %v1288_v49 = vadd.f32 %v2069_v23, %v1287_v48  ;;  %v2527_v50 = vpop.f32.mrb[43].mxu0 }
 0x373   : > { %2581 = vmatmul.mubr.msk.f32.gmra.mrb[16].mxu1 %vm942_vm1, %v1288_v49 }
 0x374   : > { %v1292_v51 = vpop.f32.mrb[44].mxu0  ;;  %2583 = vmatprep.mubr.msk.f32.mxu1 %vm2943_vm0, %v2944_v12 }
 0x375   : > { %v1293_v52 = vadd.f32 %v2069_v23, %v1292_v51  ;;  %v2530_v53 = vpop.f32.mrb[45].mxu0  ;;  %v3565_v51 = vld [vmem:[%s3695_s5 + $0x3] ss:$0 sm:$0xff] }
 0x377   : > { %2584 = vmatmul.mubr.msk.f32.gmra.mrb[18].mxu1 %vm942_vm1, %v1293_v52 }
 0x378   : > { %v1297_v54 = vpop.f32.mrb[46].mxu0  ;;  %2586 = vmatprep.mubr.msk.f32.mxu1 %vm2943_vm0, %v2944_v12 }
 0x379   : > { %v1298_v55 = vadd.f32 %v2069_v23, %v1297_v54  ;;  %v2533_v56 = vpop.f32.mrb[47].mxu0 }
 0x37b   : > { %2587 = vmatmul.mubr.msk.f32.gmra.mrb[20].mxu1 %vm942_vm1, %v1298_v55 }
 0x37c   : > { %v1302_v57 = vpop.f32.mrb[48].mxu0  ;;  %2589 = vmatprep.mubr.msk.f32.mxu1 %vm2943_vm0, %v2944_v12 }
 0x37d   : > { %v1303_v58 = vadd.f32 %v2069_v23, %v1302_v57  ;;  %v2536_v59 = vpop.f32.mrb[49].mxu0 }
 0x37f   : > { %2590 = vmatmul.mubr.msk.f32.gmra.mrb[22].mxu1 %vm942_vm1, %v1303_v58 }
 0x380   : > { %v1307_v60 = vpop.f32.mrb[50].mxu0  ;;  %2592 = vmatprep.mubr.msk.f32.mxu1 %vm2943_vm0, %v2944_v12 }
 0x381   : > { %v1308_v61 = vadd.f32 %v2069_v23, %v1307_v60  ;;  %v2539_v62 = vpop.f32.mrb[51].mxu0 }
 0x383   : > { %2593 = vmatmul.mubr.msk.f32.gmra.mrb[24].mxu1 %vm942_vm1, %v1308_v61 }
 0x384   : > { %2666 = vmatprep.mubr.msk.f32.mxu1 %vm2943_vm0, %v2944_v12 }
 0x426   : > { %v1425_v13 = vpop.f32.mrb[0].mxu1 }
 0x427   : > { %v1489_v14 = vmax.f32 %v1425_v13, 0.0  ;;  %v2558_v15 = vpop.f32.mrb[1].mxu1 }
 0x429   : > { %2612 = vmatmul.mubr.msk.f32.vlgmr.msra.gmra.mrb[52].mxu0 %vm942_vm1, %v1489_v14 }
 0x42a   : > { %v1430_v16 = vpop.f32.mrb[2].mxu1  ;;  %2614 = vmatprep.mubr.msk.f32.mxu0 %vm2943_vm0, %v2944_v12 }
 0x42b   : > { %v1490_v17 = vmax.f32 %v1430_v16, 0.0  ;;  %v2561_v18 = vpop.f32.mrb[3].mxu1 }
 0x42d   : > { %2615 = vmatmul.mubr.msk.f32.gmra.mrb[54].mxu0 %vm942_vm1, %v1490_v17 }
 0x42e   : > { %v1435_v19 = vpop.f32.mrb[4].mxu1  ;;  %2617 = vmatprep.mubr.msk.f32.mxu0 %vm2943_vm0, %v2944_v12 }
 0x42f   : > { %v1491_v20 = vmax.f32 %v1435_v19, 0.0  ;;  %v2564_v6 = vpop.f32.mrb[5].mxu1 }
 0x431   : > { %2618 = vmatmul.mubr.msk.f32.gmra.mrb[56].mxu0 %vm942_vm1, %v1491_v20 }
 0x432   : > { %v1440_v21 = vpop.f32.mrb[6].mxu1  ;;  %2620 = vmatprep.mubr.msk.f32.mxu0 %vm2943_vm0, %v2944_v12 }
 0x433   : > { %v1492_v22 = vmax.f32 %v1440_v21, 0.0  ;;  %v2567_v23 = vpop.f32.mrb[7].mxu1 }
 0x435   : > { %2621 = vmatmul.mubr.msk.f32.gmra.mrb[58].mxu0 %vm942_vm1, %v1492_v22 }
 0x436   : > { %v1445_v24 = vpop.f32.mrb[8].mxu1  ;;  %2623 = vmatprep.mubr.msk.f32.mxu0 %vm2943_vm0, %v2944_v12 }
 0x437   : > { %v1493_v25 = vmax.f32 %v1445_v24, 0.0  ;;  %v2570_v26 = vpop.f32.mrb[9].mxu1 }
 0x439   : > { %2624 = vmatmul.mubr.msk.f32.gmra.mrb[60].mxu0 %vm942_vm1, %v1493_v25 }
 0x43a   : > { %v1450_v27 = vpop.f32.mrb[10].mxu1  ;;  %2626 = vmatprep.mubr.msk.f32.mxu0 %vm2943_vm0, %v2944_v12 }
 0x43b   : > { %v1494_v28 = vmax.f32 %v1450_v27, 0.0  ;;  %v2573_v29 = vpop.f32.mrb[11].mxu1 }
 0x43d   : > { %2627 = vmatmul.mubr.msk.f32.gmra.mrb[62].mxu0 %vm942_vm1, %v1494_v28 }
 0x43e   : > { %v1455_v30 = vpop.f32.mrb[12].mxu1  ;;  %2629 = vmatprep.mubr.msk.f32.mxu0 %vm2943_vm0, %v2944_v12 }
 0x43f   : > { %v1495_v31 = vmax.f32 %v1455_v30, 0.0  ;;  %v2576_v32 = vpop.f32.mrb[13].mxu1 }
 0x441   : > { %2630 = vmatmul.mubr.msk.f32.gmra.mrb[64].mxu0 %vm942_vm1, %v1495_v31 }
 0x442   : > { %v1460_v33 = vpop.f32.mrb[14].mxu1  ;;  %2632 = vmatprep.mubr.msk.f32.mxu0 %vm2943_vm0, %v2944_v12 }
 0x443   : > { %v1496_v34 = vmax.f32 %v1460_v33, 0.0  ;;  %v2579_v35 = vpop.f32.mrb[15].mxu1 }
 0x445   : > { %2633 = vmatmul.mubr.msk.f32.gmra.mrb[66].mxu0 %vm942_vm1, %v1496_v34 }
 0x446   : > { %v1465_v36 = vpop.f32.mrb[16].mxu1  ;;  %2635 = vmatprep.mubr.msk.f32.mxu0 %vm2943_vm0, %v2944_v12 }
 0x447   : > { %v1497_v37 = vmax.f32 %v1465_v36, 0.0  ;;  %v2582_v38 = vpop.f32.mrb[17].mxu1 }
 0x449   : > { %2636 = vmatmul.mubr.msk.f32.gmra.mrb[68].mxu0 %vm942_vm1, %v1497_v37 }
 0x44a   : > { %v1470_v39 = vpop.f32.mrb[18].mxu1  ;;  %2638 = vmatprep.mubr.msk.f32.mxu0 %vm2943_vm0, %v2944_v12 }
 0x44b   : > { %v1498_v40 = vmax.f32 %v1470_v39, 0.0  ;;  %v2585_v41 = vpop.f32.mrb[19].mxu1 }
 0x44c   : > { %v2127_v41 = vld [vmem:[%s3697_s7] ss:$0 sm:$0xff] }
 0x44d   : > { %2639 = vmatmul.mubr.msk.f32.gmra.mrb[70].mxu0 %vm942_vm1, %v1498_v40 }
 0x44e   : > { %v1475_v42 = vpop.f32.mrb[20].mxu1  ;;  %2641 = vmatprep.mubr.msk.f32.mxu0 %vm2943_vm0, %v2944_v12 }
 0x44f   : > { %v1499_v43 = vmax.f32 %v1475_v42, 0.0  ;;  %v2588_v44 = vpop.f32.mrb[21].mxu1 }
 0x451   : > { %2642 = vmatmul.mubr.msk.f32.gmra.mrb[72].mxu0 %vm942_vm1, %v1499_v43 }
 0x452   : > { %v1480_v45 = vpop.f32.mrb[22].mxu1  ;;  %2644 = vmatprep.mubr.msk.f32.mxu0 %vm2943_vm0, %v2944_v12 }
 0x453   : > { %v1500_v46 = vmax.f32 %v1480_v45, 0.0  ;;  %v2591_v47 = vpop.f32.mrb[23].mxu1 }
 0x455   : > { %2645 = vmatmul.mubr.msk.f32.gmra.mrb[74].mxu0 %vm942_vm1, %v1500_v46 }
 0x456   : > { %v1485_v48 = vpop.f32.mrb[24].mxu1  ;;  %2647 = vmatprep.mubr.msk.f32.mxu0 %vm2943_vm0, %v2944_v12 }
 0x457   : > { %v1501_v49 = vmax.f32 %v1485_v48, 0.0  ;;  %v2594_v50 = vpop.f32.mrb[25].mxu1 }
 0x459   : > { %2648 = vmatmul.mubr.msk.f32.gmra.mrb[76].mxu0 %vm942_vm1, %v1501_v49 }
 0x4fc   : > { %v1624_v52 = vpop.f32.mrb[52].mxu0 }
 0x4fd   : > { %v1625_v53 = vadd.f32 %v3565_v51, %v1624_v52  ;;  %v2613_v54 = vpop.f32.mrb[53].mxu0 }
 0x4ff   : > { %v1688_v55 = vmax.f32 %v1625_v53, 0.0 }
 0x500   : > { %v1629_v56 = vpop.f32.mrb[54].mxu0 }
 0x501   : > { %v1630_v57 = vadd.f32 %v3565_v51, %v1629_v56  ;;  %v2616_v58 = vpop.f32.mrb[55].mxu0  ;;  %2667 = vmatmul.mubr.msk.f32.vlgmr.msra.gmra.mrb[52].mxu1 %vm942_vm1, %v1688_v55 }
 0x502   : > { %2669 = vmatprep.mubr.msk.f32.mxu1 %vm2943_vm0, %v2944_v12 }
 0x503   : > { %v1689_v59 = vmax.f32 %v1630_v57, 0.0 }
 0x504   : > { %v1634_v60 = vpop.f32.mrb[56].mxu0 }
 0x505   : > { %v1635_v61 = vadd.f32 %v3565_v51, %v1634_v60  ;;  %v2619_v62 = vpop.f32.mrb[57].mxu0  ;;  %2670 = vmatmul.mubr.msk.f32.gmra.mrb[54].mxu1 %vm942_vm1, %v1689_v59 }
 0x506   : > { %2672 = vmatprep.mubr.msk.f32.mxu1 %vm2943_vm0, %v2944_v12 }
 0x507   : > { %v1690_v63 = vmax.f32 %v1635_v61, 0.0 }
 0x508   : > { %v1639_v0 = vpop.f32.mrb[58].mxu0 }
 0x509   : > { %v1640_v1 = vadd.f32 %v3565_v51, %v1639_v0  ;;  %v2622_v2 = vpop.f32.mrb[59].mxu0  ;;  %2673 = vmatmul.mubr.msk.f32.gmra.mrb[56].mxu1 %vm942_vm1, %v1690_v63 }
 0x50a   : > { %2675 = vmatprep.mubr.msk.f32.mxu1 %vm2943_vm0, %v2944_v12 }
 0x50b   : > { %v1691_v3 = vmax.f32 %v1640_v1, 0.0 }
 0x50c   : > { %v1644_v4 = vpop.f32.mrb[60].mxu0 }
 0x50d   : > { %v1645_v5 = vadd.f32 %v3565_v51, %v1644_v4  ;;  %v2625_v7 = vpop.f32.mrb[61].mxu0  ;;  %2676 = vmatmul.mubr.msk.f32.gmra.mrb[58].mxu1 %vm942_vm1, %v1691_v3 }
 0x50e   : > { %2678 = vmatprep.mubr.msk.f32.mxu1 %vm2943_vm0, %v2944_v12 }
 0x50f   : > { %v1692_v8 = vmax.f32 %v1645_v5, 0.0 }
 0x510   : > { %v1649_v9 = vpop.f32.mrb[62].mxu0 }
 0x511   : > { %v1650_v10 = vadd.f32 %v3565_v51, %v1649_v9  ;;  %v2628_v11 = vpop.f32.mrb[63].mxu0  ;;  %2679 = vmatmul.mubr.msk.f32.gmra.mrb[60].mxu1 %vm942_vm1, %v1692_v8 }
 0x512   : > { %2681 = vmatprep.mubr.msk.f32.mxu1 %vm2943_vm0, %v2944_v12 }
 0x513   : > { %v1693_v13 = vmax.f32 %v1650_v10, 0.0 }
 0x514   : > { %v1654_v14 = vpop.f32.mrb[64].mxu0 }
 0x515   : > { %v1655_v15 = vadd.f32 %v3565_v51, %v1654_v14  ;;  %v2631_v16 = vpop.f32.mrb[65].mxu0  ;;  %2682 = vmatmul.mubr.msk.f32.gmra.mrb[62].mxu1 %vm942_vm1, %v1693_v13 }
 0x516   : > { %2684 = vmatprep.mubr.msk.f32.mxu1 %vm2943_vm0, %v2944_v12 }
 0x517   : > { %v1694_v17 = vmax.f32 %v1655_v15, 0.0 }
 0x518   : > { %v1659_v18 = vpop.f32.mrb[66].mxu0 }
 0x519   : > { %v1660_v19 = vadd.f32 %v3565_v51, %v1659_v18  ;;  %v2634_v20 = vpop.f32.mrb[67].mxu0  ;;  %2685 = vmatmul.mubr.msk.f32.gmra.mrb[64].mxu1 %vm942_vm1, %v1694_v17 }
 0x51a   : > { %2687 = vmatprep.mubr.msk.f32.mxu1 %vm2943_vm0, %v2944_v12 }
 0x51b   : > { %v1695_v6 = vmax.f32 %v1660_v19, 0.0 }
 0x51c   : > { %v1664_v21 = vpop.f32.mrb[68].mxu0 }
 0x51d   : > { %v1665_v22 = vadd.f32 %v3565_v51, %v1664_v21  ;;  %v2637_v23 = vpop.f32.mrb[69].mxu0  ;;  %2688 = vmatmul.mubr.msk.f32.gmra.mrb[66].mxu1 %vm942_vm1, %v1695_v6 }
 0x51e   : > { %2690 = vmatprep.mubr.msk.f32.mxu1 %vm2943_vm0, %v2944_v12 }
 0x51f   : > { %v1696_v24 = vmax.f32 %v1665_v22, 0.0 }
 0x520   : > { %v1669_v25 = vpop.f32.mrb[70].mxu0 }
 0x521   : > { %v1670_v26 = vadd.f32 %v3565_v51, %v1669_v25  ;;  %v2640_v27 = vpop.f32.mrb[71].mxu0  ;;  %2691 = vmatmul.mubr.msk.f32.gmra.mrb[68].mxu1 %vm942_vm1, %v1696_v24 }
 0x522   : > { %2693 = vmatprep.mubr.msk.f32.mxu1 %vm2943_vm0, %v2944_v12 }
 0x523   : > { %v1697_v28 = vmax.f32 %v1670_v26, 0.0 }
 0x524   : > { %v1674_v29 = vpop.f32.mrb[72].mxu0 }
 0x525   : > { %v1675_v30 = vadd.f32 %v3565_v51, %v1674_v29  ;;  %v2643_v31 = vpop.f32.mrb[73].mxu0  ;;  %2694 = vmatmul.mubr.msk.f32.gmra.mrb[70].mxu1 %vm942_vm1, %v1697_v28 }
 0x526   : > { %2696 = vmatprep.mubr.msk.f32.mxu1 %vm2943_vm0, %v2944_v12 }
 0x527   : > { %v1698_v32 = vmax.f32 %v1675_v30, 0.0 }
 0x528   : > { %v1679_v33 = vpop.f32.mrb[74].mxu0 }
 0x529   : > { %v1680_v34 = vadd.f32 %v3565_v51, %v1679_v33  ;;  %v2646_v35 = vpop.f32.mrb[75].mxu0  ;;  %2697 = vmatmul.mubr.msk.f32.gmra.mrb[72].mxu1 %vm942_vm1, %v1698_v32 }
 0x52a   : > { %2699 = vmatprep.mubr.msk.f32.mxu1 %vm2943_vm0, %v2944_v12 }
 0x52b   : > { %v1699_v36 = vmax.f32 %v1680_v34, 0.0 }
 0x52c   : > { %v1684_v37 = vpop.f32.mrb[76].mxu0 }
 0x52d   : > { %v1685_v38 = vadd.f32 %v3565_v51, %v1684_v37  ;;  %v2649_v39 = vpop.f32.mrb[77].mxu0  ;;  %2700 = vmatmul.mubr.msk.f32.gmra.mrb[74].mxu1 %vm942_vm1, %v1699_v36 }
 0x52e   : > { %2702 = vmatprep.mubr.msk.f32.mxu1 %vm2943_vm0, %v2944_v12 }
 0x52f   : > { %v1700_v40 = vmax.f32 %v1685_v38, 0.0 }
 0x531   : > { %2703 = vmatmul.mubr.msk.f32.gmra.mrb[76].mxu1 %vm942_vm1, %v1700_v40 }
 0x5d4   : > { %v1821_v42 = vpop.f32.mrb[52].mxu1 }
 0x5d5   : > { %v1822_v43 = vadd.f32 %v2127_v41, %v1821_v42  ;;  %v2668_v44 = vpop.f32.mrb[53].mxu1 }
 0x5d7   : > { %1885 = vst [vmem:[%s3623_s19] sm:$0xff] %v1822_v43 }
 0x5d8   : > { %v1826_v12 = vpop.f32.mrb[54].mxu1 }
 0x5d9   : > { %v1827_v45 = vadd.f32 %v2127_v41, %v1826_v12  ;;  %v2671_v46 = vpop.f32.mrb[55].mxu1 }
 0x5db   : > { %1886 = vst [vmem:[%s3623_s19 + $0x8] sm:$0xff] %v1827_v45 }
 0x5dc   : > { %v1831_v47 = vpop.f32.mrb[56].mxu1 }
 0x5dd   : > { %v1832_v48 = vadd.f32 %v2127_v41, %v1831_v47  ;;  %v2674_v49 = vpop.f32.mrb[57].mxu1 }
 0x5df   : > { %1887 = vst [vmem:[%s3623_s19 + $0x10] sm:$0xff] %v1832_v48 }
 0x5e0   : > { %v1836_v50 = vpop.f32.mrb[58].mxu1 }
 0x5e1   : > { %v1837_v51 = vadd.f32 %v2127_v41, %v1836_v50  ;;  %v2677_v52 = vpop.f32.mrb[59].mxu1 }
 0x5e3   : > { %1888 = vst [vmem:[%s3623_s19 + $0x18] sm:$0xff] %v1837_v51 }
 0x5e4   : > { %v1841_v53 = vpop.f32.mrb[60].mxu1 }
 0x5e5   : > { %v1842_v54 = vadd.f32 %v2127_v41, %v1841_v53  ;;  %v2680_v55 = vpop.f32.mrb[61].mxu1 }
 0x5e7   : > { %1889 = vst [vmem:[%s3623_s19 + $0x20] sm:$0xff] %v1842_v54 }
 0x5e8   : > { %v1846_v56 = vpop.f32.mrb[62].mxu1 }
 0x5e9   : > { %v1847_v57 = vadd.f32 %v2127_v41, %v1846_v56  ;;  %v2683_v58 = vpop.f32.mrb[63].mxu1 }
 0x5eb   : > { %1890 = vst [vmem:[%s3623_s19 + $0x28] sm:$0xff] %v1847_v57 }
 0x5ec   : > { %v1851_v59 = vpop.f32.mrb[64].mxu1 }
 0x5ed   : > { %v1852_v60 = vadd.f32 %v2127_v41, %v1851_v59  ;;  %v2686_v61 = vpop.f32.mrb[65].mxu1 }
 0x5ef   : > { %1891 = vst [vmem:[%s3623_s19 + $0x30] sm:$0xff] %v1852_v60 }
 0x5f0   : > { %v1856_v62 = vpop.f32.mrb[66].mxu1 }
 0x5f1   : > { %v1857_v63 = vadd.f32 %v2127_v41, %v1856_v62  ;;  %v2689_v0 = vpop.f32.mrb[67].mxu1 }
 0x5f3   : > { %1892 = vst [vmem:[%s3623_s19 + $0x38] sm:$0xff] %v1857_v63 }
 0x5f4   : > { %v1861_v1 = vpop.f32.mrb[68].mxu1 }
 0x5f5   : > { %v1862_v2 = vadd.f32 %v2127_v41, %v1861_v1  ;;  %v2692_v3 = vpop.f32.mrb[69].mxu1 }
 0x5f7   : > { %1893 = vst [vmem:[%s3623_s19 + $0x40] sm:$0xff] %v1862_v2 }
 0x5f8   : > { %v1866_v4 = vpop.f32.mrb[70].mxu1 }
 0x5f9   : > { %v1867_v5 = vadd.f32 %v2127_v41, %v1866_v4  ;;  %v2695_v7 = vpop.f32.mrb[71].mxu1 }
 0x5fb   : > { %1894 = vst [vmem:[%s3623_s19 + $0x48] sm:$0xff] %v1867_v5 }
 0x5fc   : > { %v1871_v8 = vpop.f32.mrb[72].mxu1 }
 0x5fd   : > { %v1872_v9 = vadd.f32 %v2127_v41, %v1871_v8  ;;  %v2698_v10 = vpop.f32.mrb[73].mxu1 }
 0x5ff   : > { %1895 = vst [vmem:[%s3623_s19 + $0x50] sm:$0xff] %v1872_v9 }
 0x600   : > { %v1876_v11 = vpop.f32.mrb[74].mxu1 }
 0x601   : > { %v1877_v13 = vadd.f32 %v2127_v41, %v1876_v11  ;;  %v2701_v14 = vpop.f32.mrb[75].mxu1 }
 0x603   : > { %1896 = vst [vmem:[%s3623_s19 + $0x58] sm:$0xff] %v1877_v13 }
 0x604   : > { %v1881_v15 = vpop.f32.mrb[76].mxu1 }
 0x605   : > { %v1882_v16 = vadd.f32 %v2127_v41, %v1881_v15  ;;  %v2704_v17 = vpop.f32.mrb[77].mxu1 }
 0x607   : > { %1897 = vst [vmem:[%s3623_s19 + $0x60] sm:$0xff] %v1882_v16 }
 0x608   : > { %2890 = shalt.err (!%p2887_p3)
}
 0x609   : > { %s2891_s10 = scalar_lea.hbm %s3642_s26, 1664  ;;  %s2895_s19 = scalar_lea.hbm %s3698_s8, 3328 }
 0x60a   : > { %p2892_p4 = scmp.ne.s32.totalorder %s3642_s26, %s2891_s10  ;;  %p2896_p9 = scmp.lt.u32.totalorder %s3642_s26, %s3698_s8 }
 0x60b   : > { %p2897_p10 = scmp.lt.u32.totalorder %s2895_s19, %s2891_s10  ;;  %p2899_p12 = scmp.lt.u32.totalorder %s2891_s10, %s3642_s26 }
 0x60c   : > { %p2893_p7 = pnand %p2892_p4, %p3031_p5 }
 0x60d   : > { %p2898_p11 = por %p2897_p10, %p2896_p9 }
 0x60e   : > { %p2894_p8 = pneg %p2893_p7 }
 0x60f   : > { %p2900_p13 = por %p2899_p12, %p2898_p11 }
 0x611   : > { %p2901_p0 = pnand %p2900_p13, %p2894_p8 }
 0x613   : > { %2904 = shalt.err (!%p2901_p0)
}
 0x614   : > { %s2946_s17 = smov 128   ;;  %s2947_s23 = smov 8  }
 0x615   : > { %2830 = dma.vmem_to_hbm [thread:$0]  (%p3031_p5), %s3644_s21, 1664, %s3642_s26, %s3649_s9, %s2946_s17, %s2946_s17, %s2947_s23  }
 0x616 PF: > { %p2836_p1 = scmp.ge.s32.totalorder %s2939_s30, 2  ;;  %s1927_s24 = sand.u32 1, %s2927_s27  }
 0x617   : > { %s1928_s25 = scalar_lea.sflag [#allocation3], %s1927_s24 }
 0x618   : > { %p2833_p2 = pnand %p2836_p1, %p3035_p6 }
 0x61a   : > { %2922 = dma.done.wait (!%p2833_p2), %s1928_s25, 1664  }
 0x61b   : > { %2924 = vsyncadd (!%p2833_p2), %s1928_s25, 4294965632  ;;  %p18_p3 = scmp.ge.s32.totalorder %s3018_s11, 4   ;;  %s3701_s27 = smov %s2931_s28 }
 0x61c   : > { %s3702_s28 = smov %s2935_s29  ;;  %s3703_s29 = smov %s3029_s14 }
 0x61d   : > { %s3704_s30 = smov %s3018_s11  ;;  %20 = sbr.rel (!%p18_p3) target bundleno = 3 (0x3), region = 96 }
 0x624   :  { %1933 = vsyncpa [#allocation3], 1 }
 0x625   :  { %1935 = vsyncpa [#allocation3 + $0x1], 1 }

</bundles_post_ra>
